<compile_context>
chip_gen: v7x
topology: tpu7x:2x2x1
jax: 0.10.0
libtpu: 0.0.40
codegen_flags: <defaults>
</compile_context>

<pallas_src>
import functools

import numpy as np
import jax
import jax.numpy as jnp
from jax import lax
from jax.experimental import pallas as pl
from jax.experimental.pallas import tpu as pltpu

_VMEM_LIMIT_BYTES = 48 * 1024 * 1024     # scoped-VMEM ceiling (safe on v5e/v6e/v7x)
_VMEM_BLOCK_BUDGET = 20 << 20            # target working set per grid step


def _extract_lane(x, i):
    """x[:, :, i:i+1] for a Python-int or traced lane index (value, lane last)."""
    if isinstance(i, (int, np.integer)):
        return x[:, :, i:i + 1]
    return lax.dynamic_slice_in_dim(x, i, 1, axis=2)


def _decoder_kernel(scores_ref, regs_ref, anchors_ref, out_ref, supmat_ref, *,
                    img_size, min_score_threshold, min_volume, nms_threshold,
                    num_valid_k):
    f32 = jnp.float32
    Bb, _, Kp = scores_ref.shape           # (B_blk, 1, K_padded)
    M = out_ref.shape[1]                   # max_detection_num

    s_row = scores_ref[...]                # (Bb, 1, Kp)  candidate on lanes
    regs = regs_ref[...]                   # (Bb, 6, Kp)
    anch = anchors_ref[...]                # (Bb, 6, Kp)

    # ---- decode ONCE, row layout (candidate axis on lanes) ----
    ctr_a, sz_a = anch[:, 0:3, :], anch[:, 3:6, :]
    ctr = regs[:, 0:3, :] * sz_a + ctr_a
    sz = jnp.exp(regs[:, 3:6, :]) * sz_a
    mins_r = jnp.maximum(ctr - 0.5 * sz, 0.0)
    didx = lax.broadcasted_iota(jnp.int32, ctr.shape, 1)
    cap = jnp.where(didx == 0, f32(img_size[0] - 1),
          jnp.where(didx == 1, f32(img_size[1] - 1), f32(img_size[2] - 1)))
    maxs_r = jnp.minimum(ctr + 0.5 * sz, cap)
    ext_r = maxs_r - mins_r
    vol_r = ext_r[:, 0:1, :] * ext_r[:, 1:2, :] * ext_r[:, 2:3, :]       # (Bb,1,Kp)

    valid = (s_row > f32(min_score_threshold)) & (vol_r > f32(min_volume))

    # ---- column layout via ONE tile-aligned transpose: (Bb,8,Kp) -> (Bb,Kp,8) ----
    ones_row = jnp.ones_like(s_row)
    payload_row = jnp.concatenate([mins_r, maxs_r, s_row, ones_row], axis=1)
    payload_col = jnp.transpose(payload_row, (0, 2, 1))                  # (Bb,Kp,8)
    mins_c = payload_col[:, :, 0:3]
    maxs_c = payload_col[:, :, 3:6]
    ext_c = maxs_c - mins_c
    vol_c = ext_c[:, :, 0:1] * ext_c[:, :, 1:2] * ext_c[:, :, 2:3]       # (Bb,Kp,1)

    # ---- pairwise suppression matrix (divide-free: inter >= thr * union) ----
    # TODO(synk): on v5e, storing this mask as bfloat16 would halve the vst bytes
    # of the dominant store burst; kept f32 here for maximal lowering safety.
    inter = f32(1.0)
    for d in range(3):
        lo = jnp.maximum(mins_c[:, :, d:d + 1], mins_r[:, d:d + 1, :])   # (Bb,Kp,Kp)
        hi = jnp.minimum(maxs_c[:, :, d:d + 1], maxs_r[:, d:d + 1, :])
        inter = inter * jnp.maximum(hi - lo, 0.0)
    union = vol_c + vol_r - inter
    supmat_ref[...] = (inter >= f32(nms_threshold) * union).astype(f32)

    # ---- greedy NMS; a running kept-count gives each kept candidate's rank ----
    lane = lax.broadcasted_iota(jnp.int32, (Bb, 1, Kp), 2)
    sup0 = (~valid).astype(f32)            # invalid candidates start suppressed
    keep0 = jnp.zeros((Bb, 1, Kp), f32)
    rank0 = jnp.zeros((Bb, 1, Kp), f32)
    cnt0 = jnp.zeros((Bb, 1, 1), f32)

    def body(i, carry):
        sup, keep, rank, cnt = carry
        active = (_extract_lane(sup, i) < 0.5).astype(f32)               # (Bb,1,1)
        onehot = (lane == i).astype(f32)                                 # (Bb,1,Kp)
        keep = keep + active * onehot
        rank = rank + (active * cnt) * onehot
        cnt = cnt + active
        row_i = supmat_ref[:, pl.ds(i, 1), :]                            # (Bb,1,Kp)
        sup = jnp.maximum(sup, active * row_i)
        return sup, keep, rank, cnt

    carry = (sup0, keep0, rank0, cnt0)
    if num_valid_k <= 32:
        # small top_k: fully unrolled with static slices everywhere
        for i in range(num_valid_k):
            carry = body(i, carry)
    else:
        # production top_k: partial unroll keeps scheduler visibility w/o spills
        carry = lax.fori_loop(0, num_valid_k, body, carry, unroll=8)
    _, keep, rank, _ = carry

    # ---- scatter kept boxes into score-rank slots with one small MXU matmul ----
    rank_i = rank.astype(jnp.int32)                                      # exact ints
    m_iota = lax.broadcasted_iota(jnp.int32, (Bb, M, Kp), 1)
    slot = ((m_iota == rank_i) & (keep > 0.5)).astype(f32)               # (Bb,M,Kp)
    out8 = jnp.einsum('bmk,bkc->bmc', slot, payload_col,
                      preferred_element_type=f32)                        # (Bb,M,8)
    count = out8[:, :, 7:8]
    out_ref[...] = jnp.where(count > 0.5, out8, f32(-1.0))


def _pick_block(B, Kp, M, max_blk):
    """Images folded per grid step: VMEM-budgeted, divides B, grid >= 2 if B >= 2."""
    per_img = (3 * Kp * Kp * 4            # supmat scratch + live KxK f32 temporaries
               + 2 * 24 * Kp * 4          # double-buffered sublane-padded inputs
               + (16 + M) * Kp * 4        # payload row/col + slot matrix
               + 2 * M * 128 * 4)         # double-buffered lane-padded output
    cap = min(max_blk, max(1, _VMEM_BLOCK_BUDGET // per_img))
    if B >= 2:
        cap = min(cap, B // 2)            # keep grid length >= 2 for v7x's 2 TCs
    cap = max(1, cap)
    for cand in range(min(B, cap), 0, -1):
        if B % cand == 0:
            return cand
    return 1


def make_decoder(img_size, top_k, min_score_threshold, min_volume,
                 nms_threshold, max_detection_num, max_images_per_step=8):
    K, M = top_k, max_detection_num
    Kp = max(128, ((K + 127) // 128) * 128)          # lane-pad candidate axis
    score_pad = float(min(min_score_threshold, 0.0) - 1.0)   # finite, below threshold

    kernel = functools.partial(
        _decoder_kernel, img_size=img_size,
        min_score_threshold=min_score_threshold, min_volume=min_volume,
        nms_threshold=nms_threshold, num_valid_k=K)

    @jax.jit
    def forward(cls_heads, reg_heads, batch_anchors):
        B = cls_heads.shape[0]
        b_blk = _pick_block(B, Kp, M, max_images_per_step)

        # TODO(synk): torch.topk + gather over all N anchors stays in the JAX
        # wrapper (lax.top_k + take_along_axis); fusing the gather in-kernel
        # would mean K tiny 24-byte row DMAs per image.
        topk_scores, topk_idx = lax.top_k(cls_heads.astype(jnp.float32), K)     # (B,K)
        topk_regs = jnp.take_along_axis(reg_heads.astype(jnp.float32),
                                        topk_idx[..., None], axis=1)            # (B,K,6)
        topk_anchors = batch_anchors.astype(jnp.float32)[topk_idx]              # (B,K,6)

        pad = Kp - K
        scores_row = jnp.pad(topk_scores[:, None, :], ((0, 0), (0, 0), (0, pad)),
                             constant_values=score_pad)                         # (B,1,Kp)
        regs_row = jnp.pad(jnp.transpose(topk_regs, (0, 2, 1)),
                           ((0, 0), (0, 0), (0, pad)))                          # (B,6,Kp)
        anchors_row = jnp.pad(jnp.transpose(topk_anchors, (0, 2, 1)),
                              ((0, 0), (0, 0), (0, pad)))                       # (B,6,Kp)

        imap = lambda g: (g, 0, 0)
        out = pl.pallas_call(
            kernel,
            out_shape=jax.ShapeDtypeStruct((B, M, 8), jnp.float32),
            grid=(B // b_blk,),
            in_specs=[
                pl.BlockSpec((b_blk, 1, Kp), imap),
                pl.BlockSpec((b_blk, 6, Kp), imap),
                pl.BlockSpec((b_blk, 6, Kp), imap),
            ],
            out_specs=pl.BlockSpec((b_blk, M, 8), imap),
            scratch_shapes=[pltpu.VMEM((b_blk, Kp, Kp), jnp.float32)],
            compiler_params=pltpu.CompilerParams(
                dimension_semantics=("parallel",),
                vmem_limit_bytes=_VMEM_LIMIT_BYTES),
        )(scores_row, regs_row, anchors_row)

        return out[..., 6], out[..., :6]      # (B, M) scores, (B, M, 6) boxes

    return forward


def _np_reference(cls_heads, reg_heads, anchors, *, img_size, top_k,
                  min_score_threshold, min_volume, nms_threshold,
                  max_detection_num):
    B = cls_heads.shape[0]
    M = max_detection_num
    out_s = -np.ones((B, M), np.float32)
    out_b = -np.ones((B, M, 6), np.float32)
    for b in range(B):
        order = np.argsort(-cls_heads[b], kind="stable")[:top_k]
        s = cls_heads[b][order].astype(np.float32)
        r = reg_heads[b][order].astype(np.float32)
        a = anchors[order].astype(np.float32)
        cx = r[:, 0] * a[:, 3] + a[:, 0]
        cy = r[:, 1] * a[:, 4] + a[:, 1]
        cz = r[:, 2] * a[:, 5] + a[:, 2]
        w = np.exp(r[:, 3]) * a[:, 3]
        h = np.exp(r[:, 4]) * a[:, 4]
        d = np.exp(r[:, 5]) * a[:, 5]
        x1 = np.maximum(cx - w / 2, 0.0)
        y1 = np.maximum(cy - h / 2, 0.0)
        z1 = np.maximum(cz - d / 2, 0.0)
        x2 = np.minimum(cx + w / 2, img_size[0] - 1)
        y2 = np.minimum(cy + h / 2, img_size[1] - 1)
        z2 = np.minimum(cz + d / 2, img_size[2] - 1)
        boxes = np.stack([x1, y1, z1, x2, y2, z2], axis=-1)
        m1 = s > min_score_threshold
        boxes, s1 = boxes[m1], s[m1]
        vol = ((boxes[:, 3] - boxes[:, 0]) * (boxes[:, 4] - boxes[:, 1]) *
               (boxes[:, 5] - boxes[:, 2]))
        m2 = vol > min_volume
        boxes, s2 = boxes[m2], s1[m2]
        if s2.shape[0] == 0:
            continue
        o2 = np.argsort(-s2, kind="stable")
        boxes, s2 = boxes[o2], s2[o2]
        vols = ((boxes[:, 3] - boxes[:, 0]) * (boxes[:, 4] - boxes[:, 1]) *
                (boxes[:, 5] - boxes[:, 2]))
        order2 = np.argsort(-s2, kind="stable")
        keep_b, keep_s = [], []
        while order2.size > 0:
            mi = order2[0]
            keep_b.append(boxes[mi]); keep_s.append(s2[mi])
            rest = order2[1:]
            if rest.size == 0:
                break
            inter = np.ones(rest.shape[0], np.float32)
            for dd in range(3):
                lo = np.maximum(boxes[mi, dd], boxes[rest, dd])
                hi = np.minimum(boxes[mi, dd + 3], boxes[rest, dd + 3])
                inter = inter * np.maximum(hi - lo, 0.0)
            ratio = inter / (vols[mi] + vols[rest] - inter)
            order2 = rest[ratio < nms_threshold]
        keep_b = np.stack(keep_b, axis=0)
        keep_s = np.asarray(keep_s, np.float32)
        n = min(M, keep_s.shape[0])
        out_s[b, :n] = keep_s[:n]
        out_b[b, :n] = keep_b[:n]
    return out_s, out_b


if __name__ == "__main__":
    B, N = 2, 64
    cfg = dict(img_size=(16, 16, 16), top_k=8, min_score_threshold=0.3,
               min_volume=0.5, nms_threshold=0.3, max_detection_num=4)

    key = jax.random.PRNGKey(0)
    k1, k2, k3, k4 = jax.random.split(key, 4)
    cls_heads = jax.random.uniform(k1, (B, N), jnp.float32)
    reg_heads = 0.2 * jax.random.normal(k2, (B, N, 6), dtype=jnp.float32)
    centers = jax.random.uniform(k3, (N, 3), jnp.float32, 2.0, 14.0)
    sizes = jax.random.uniform(k4, (N, 3), jnp.float32, 2.0, 5.0)
    batch_anchors = jnp.concatenate([centers, sizes], axis=1)

    decoder = make_decoder(**cfg)
    scores, boxes = decoder(cls_heads, reg_heads, batch_anchors)
    jax.block_until_ready((scores, boxes))

    ref_s, ref_b = _np_reference(np.asarray(cls_heads), np.asarray(reg_heads),
                                 np.asarray(batch_anchors), **cfg)
    assert scores.shape == (B, cfg["max_detection_num"])
    assert boxes.shape == (B, cfg["max_detection_num"], 6)
    assert np.allclose(np.asarray(scores), ref_s, atol=1e-3)
    assert np.allclose(np.asarray(boxes), ref_b, atol=1e-3)
    print("KERNEL_OK")
</pallas_src>

<mosaic_0001>
module attributes {stable_mosaic.version = 11 : i64} {
  func.func @_decoder_kernel(%arg0: i32, %arg1: memref<1x1x128xf32, #tpu.memory_space<vmem>>, %arg2: memref<1x6x128xf32, #tpu.memory_space<vmem>>, %arg3: memref<1x6x128xf32, #tpu.memory_space<vmem>>, %arg4: memref<1x4x8xf32, #tpu.memory_space<vmem>>, %arg5: memref<1x128x128xf32, #tpu.memory_space<vmem>>) attributes {dimension_semantics = [#tpu.dimension_semantics<parallel>], iteration_bounds = array<i64: 2>, scalar_prefetch = 0 : i64, scratch_operands = 1 : i64, tpu.core_type = #tpu.core_type<tc>, window_params = [{transform_indices = @transform_0, window_bounds = array<i64: 1, 1, 128>}, {transform_indices = @transform_1, window_bounds = array<i64: 1, 6, 128>}, {transform_indices = @transform_2, window_bounds = array<i64: 1, 6, 128>}, {transform_indices = @transform_3, window_bounds = array<i64: 1, 4, 8>}]} {
    %c0 = arith.constant 0 : index
    %c0_0 = arith.constant 0 : index
    %c0_1 = arith.constant 0 : index
    %0 = vector.load %arg1[%c0, %c0_0, %c0_1] : memref<1x1x128xf32, #tpu.memory_space<vmem>>, vector<1x1x128xf32>
    %c0_2 = arith.constant 0 : index
    %c0_3 = arith.constant 0 : index
    %c0_4 = arith.constant 0 : index
    %1 = vector.load %arg2[%c0_2, %c0_3, %c0_4] : memref<1x6x128xf32, #tpu.memory_space<vmem>>, vector<1x6x128xf32>
    %c0_5 = arith.constant 0 : index
    %c0_6 = arith.constant 0 : index
    %c0_7 = arith.constant 0 : index
    %2 = vector.load %arg3[%c0_5, %c0_6, %c0_7] : memref<1x6x128xf32, #tpu.memory_space<vmem>>, vector<1x6x128xf32>
    %3 = vector.extract_strided_slice %2 {offsets = [0, 0, 0], sizes = [1, 3, 128], strides = [1, 1, 1]} : vector<1x6x128xf32> to vector<1x3x128xf32>
    %4 = vector.extract_strided_slice %2 {offsets = [0, 3, 0], sizes = [1, 3, 128], strides = [1, 1, 1]} : vector<1x6x128xf32> to vector<1x3x128xf32>
    %5 = vector.extract_strided_slice %1 {offsets = [0, 0, 0], sizes = [1, 3, 128], strides = [1, 1, 1]} : vector<1x6x128xf32> to vector<1x3x128xf32>
    %6 = arith.mulf %5, %4 : vector<1x3x128xf32>
    %7 = arith.addf %6, %3 : vector<1x3x128xf32>
    %8 = vector.extract_strided_slice %1 {offsets = [0, 3, 0], sizes = [1, 3, 128], strides = [1, 1, 1]} : vector<1x6x128xf32> to vector<1x3x128xf32>
    %9 = math.exp %8 : vector<1x3x128xf32>
    %10 = arith.mulf %9, %4 : vector<1x3x128xf32>
    %cst = arith.constant 5.000000e-01 : f32
    %11 = vector.broadcast %cst : f32 to vector<1x3x128xf32>
    %12 = arith.mulf %11, %10 : vector<1x3x128xf32>
    %13 = arith.subf %7, %12 : vector<1x3x128xf32>
    %cst_8 = arith.constant 0.000000e+00 : f32
    %14 = vector.broadcast %cst_8 : f32 to vector<1x3x128xf32>
    %15 = arith.maximumf %13, %14 : vector<1x3x128xf32>
    %16 = tpu.iota {dimensions = array<i32: 1>} : vector<1x3x128xi32>
    %c0_i32 = arith.constant 0 : i32
    %17 = vector.broadcast %c0_i32 : i32 to vector<1x3x128xi32>
    %18 = arith.cmpi eq, %16, %17 : vector<1x3x128xi32>
    %c1_i32 = arith.constant 1 : i32
    %19 = vector.broadcast %c1_i32 : i32 to vector<1x3x128xi32>
    %20 = arith.cmpi eq, %16, %19 : vector<1x3x128xi32>
    %cst_9 = arith.constant 1.500000e+01 : f32
    %cst_10 = arith.constant 1.500000e+01 : f32
    %21 = vector.broadcast %cst_9 : f32 to vector<1x3x128xf32>
    %22 = vector.broadcast %cst_10 : f32 to vector<1x3x128xf32>
    %23 = arith.select %20, %21, %22 : vector<1x3x128xi1>, vector<1x3x128xf32>
    %cst_11 = arith.constant 1.500000e+01 : f32
    %24 = vector.broadcast %cst_11 : f32 to vector<1x3x128xf32>
    %25 = arith.select %18, %24, %23 : vector<1x3x128xi1>, vector<1x3x128xf32>
    %cst_12 = arith.constant 5.000000e-01 : f32
    %26 = vector.broadcast %cst_12 : f32 to vector<1x3x128xf32>
    %27 = arith.mulf %26, %10 : vector<1x3x128xf32>
    %28 = arith.addf %7, %27 : vector<1x3x128xf32>
    %29 = arith.minimumf %28, %25 : vector<1x3x128xf32>
    %30 = arith.subf %29, %15 : vector<1x3x128xf32>
    %31 = vector.extract_strided_slice %30 {offsets = [0, 0, 0], sizes = [1, 1, 128], strides = [1, 1, 1]} : vector<1x3x128xf32> to vector<1x1x128xf32>
    %32 = vector.extract_strided_slice %30 {offsets = [0, 1, 0], sizes = [1, 1, 128], strides = [1, 1, 1]} : vector<1x3x128xf32> to vector<1x1x128xf32>
    %33 = arith.mulf %31, %32 : vector<1x1x128xf32>
    %34 = vector.extract_strided_slice %30 {offsets = [0, 2, 0], sizes = [1, 1, 128], strides = [1, 1, 1]} : vector<1x3x128xf32> to vector<1x1x128xf32>
    %35 = arith.mulf %33, %34 : vector<1x1x128xf32>
    %cst_13 = arith.constant 3.000000e-01 : f32
    %36 = vector.broadcast %cst_13 : f32 to vector<1x1x128xf32>
    %37 = arith.cmpf ogt, %0, %36 : vector<1x1x128xf32>
    %cst_14 = arith.constant 5.000000e-01 : f32
    %38 = vector.broadcast %cst_14 : f32 to vector<1x1x128xf32>
    %39 = arith.cmpf ogt, %35, %38 : vector<1x1x128xf32>
    %40 = arith.andi %37, %39 : vector<1x1x128xi1>
    %cst_15 = arith.constant 1.000000e+00 : f32
    %41 = vector.broadcast %cst_15 : f32 to vector<1x1x128xf32>
    %42 = tpu.concatenate %15, %29, %0, %41 in 1 : vector<1x3x128xf32>, vector<1x3x128xf32>, vector<1x1x128xf32>, vector<1x1x128xf32> -> vector<1x8x128xf32>
    %43 = tpu.transpose %42, [0, 2, 1] : vector<1x8x128xf32> -> vector<1x128x8xf32>
    %44 = vector.extract_strided_slice %43 {offsets = [0, 0, 0], sizes = [1, 128, 3], strides = [1, 1, 1]} : vector<1x128x8xf32> to vector<1x128x3xf32>
    %45 = vector.extract_strided_slice %43 {offsets = [0, 0, 3], sizes = [1, 128, 3], strides = [1, 1, 1]} : vector<1x128x8xf32> to vector<1x128x3xf32>
    %46 = arith.subf %45, %44 : vector<1x128x3xf32>
    %47 = vector.extract_strided_slice %46 {offsets = [0, 0, 0], sizes = [1, 128, 1], strides = [1, 1, 1]} : vector<1x128x3xf32> to vector<1x128x1xf32>
    %48 = vector.extract_strided_slice %46 {offsets = [0, 0, 1], sizes = [1, 128, 1], strides = [1, 1, 1]} : vector<1x128x3xf32> to vector<1x128x1xf32>
    %49 = arith.mulf %47, %48 : vector<1x128x1xf32>
    %50 = vector.extract_strided_slice %46 {offsets = [0, 0, 2], sizes = [1, 128, 1], strides = [1, 1, 1]} : vector<1x128x3xf32> to vector<1x128x1xf32>
    %51 = arith.mulf %49, %50 : vector<1x128x1xf32>
    %52 = vector.extract_strided_slice %44 {offsets = [0, 0, 0], sizes = [1, 128, 1], strides = [1, 1, 1]} : vector<1x128x3xf32> to vector<1x128x1xf32>
    %53 = vector.extract_strided_slice %15 {offsets = [0, 0, 0], sizes = [1, 1, 128], strides = [1, 1, 1]} : vector<1x3x128xf32> to vector<1x1x128xf32>
    %54 = vector.broadcast %52 : vector<1x128x1xf32> to vector<1x128x128xf32>
    %55 = vector.broadcast %53 : vector<1x1x128xf32> to vector<1x128x128xf32>
    %56 = arith.maximumf %54, %55 : vector<1x128x128xf32>
    %57 = vector.extract_strided_slice %45 {offsets = [0, 0, 0], sizes = [1, 128, 1], strides = [1, 1, 1]} : vector<1x128x3xf32> to vector<1x128x1xf32>
    %58 = vector.extract_strided_slice %29 {offsets = [0, 0, 0], sizes = [1, 1, 128], strides = [1, 1, 1]} : vector<1x3x128xf32> to vector<1x1x128xf32>
    %59 = vector.broadcast %57 : vector<1x128x1xf32> to vector<1x128x128xf32>
    %60 = vector.broadcast %58 : vector<1x1x128xf32> to vector<1x128x128xf32>
    %61 = arith.minimumf %59, %60 : vector<1x128x128xf32>
    %62 = arith.subf %61, %56 : vector<1x128x128xf32>
    %cst_16 = arith.constant 0.000000e+00 : f32
    %63 = vector.broadcast %cst_16 : f32 to vector<1x128x128xf32>
    %64 = arith.maximumf %62, %63 : vector<1x128x128xf32>
    %cst_17 = arith.constant 1.000000e+00 : f32
    %65 = vector.broadcast %cst_17 : f32 to vector<1x128x128xf32>
    %66 = arith.mulf %65, %64 : vector<1x128x128xf32>
    %67 = vector.extract_strided_slice %44 {offsets = [0, 0, 1], sizes = [1, 128, 1], strides = [1, 1, 1]} : vector<1x128x3xf32> to vector<1x128x1xf32>
    %68 = vector.extract_strided_slice %15 {offsets = [0, 1, 0], sizes = [1, 1, 128], strides = [1, 1, 1]} : vector<1x3x128xf32> to vector<1x1x128xf32>
    %69 = vector.broadcast %67 : vector<1x128x1xf32> to vector<1x128x128xf32>
    %70 = vector.broadcast %68 : vector<1x1x128xf32> to vector<1x128x128xf32>
    %71 = arith.maximumf %69, %70 : vector<1x128x128xf32>
    %72 = vector.extract_strided_slice %45 {offsets = [0, 0, 1], sizes = [1, 128, 1], strides = [1, 1, 1]} : vector<1x128x3xf32> to vector<1x128x1xf32>
    %73 = vector.extract_strided_slice %29 {offsets = [0, 1, 0], sizes = [1, 1, 128], strides = [1, 1, 1]} : vector<1x3x128xf32> to vector<1x1x128xf32>
    %74 = vector.broadcast %72 : vector<1x128x1xf32> to vector<1x128x128xf32>
    %75 = vector.broadcast %73 : vector<1x1x128xf32> to vector<1x128x128xf32>
    %76 = arith.minimumf %74, %75 : vector<1x128x128xf32>
    %77 = arith.subf %76, %71 : vector<1x128x128xf32>
    %cst_18 = arith.constant 0.000000e+00 : f32
    %78 = vector.broadcast %cst_18 : f32 to vector<1x128x128xf32>
    %79 = arith.maximumf %77, %78 : vector<1x128x128xf32>
    %80 = arith.mulf %66, %79 : vector<1x128x128xf32>
    %81 = vector.extract_strided_slice %44 {offsets = [0, 0, 2], sizes = [1, 128, 1], strides = [1, 1, 1]} : vector<1x128x3xf32> to vector<1x128x1xf32>
    %82 = vector.extract_strided_slice %15 {offsets = [0, 2, 0], sizes = [1, 1, 128], strides = [1, 1, 1]} : vector<1x3x128xf32> to vector<1x1x128xf32>
    %83 = vector.broadcast %81 : vector<1x128x1xf32> to vector<1x128x128xf32>
    %84 = vector.broadcast %82 : vector<1x1x128xf32> to vector<1x128x128xf32>
    %85 = arith.maximumf %83, %84 : vector<1x128x128xf32>
    %86 = vector.extract_strided_slice %45 {offsets = [0, 0, 2], sizes = [1, 128, 1], strides = [1, 1, 1]} : vector<1x128x3xf32> to vector<1x128x1xf32>
    %87 = vector.extract_strided_slice %29 {offsets = [0, 2, 0], sizes = [1, 1, 128], strides = [1, 1, 1]} : vector<1x3x128xf32> to vector<1x1x128xf32>
    %88 = vector.broadcast %86 : vector<1x128x1xf32> to vector<1x128x128xf32>
    %89 = vector.broadcast %87 : vector<1x1x128xf32> to vector<1x128x128xf32>
    %90 = arith.minimumf %88, %89 : vector<1x128x128xf32>
    %91 = arith.subf %90, %85 : vector<1x128x128xf32>
    %cst_19 = arith.constant 0.000000e+00 : f32
    %92 = vector.broadcast %cst_19 : f32 to vector<1x128x128xf32>
    %93 = arith.maximumf %91, %92 : vector<1x128x128xf32>
    %94 = arith.mulf %80, %93 : vector<1x128x128xf32>
    %95 = vector.broadcast %51 : vector<1x128x1xf32> to vector<1x128x128xf32>
    %96 = vector.broadcast %35 : vector<1x1x128xf32> to vector<1x128x128xf32>
    %97 = arith.addf %95, %96 : vector<1x128x128xf32>
    %98 = arith.subf %97, %94 : vector<1x128x128xf32>
    %cst_20 = arith.constant 3.000000e-01 : f32
    %99 = vector.broadcast %cst_20 : f32 to vector<1x128x128xf32>
    %100 = arith.mulf %99, %98 : vector<1x128x128xf32>
    %101 = arith.cmpf oge, %94, %100 : vector<1x128x128xf32>
    %102 = arith.extui %101 : vector<1x128x128xi1> to vector<1x128x128xi32>
    %103 = arith.sitofp %102 : vector<1x128x128xi32> to vector<1x128x128xf32>
    %c0_21 = arith.constant 0 : index
    %c0_22 = arith.constant 0 : index
    %c0_23 = arith.constant 0 : index
    %104 = vector.load %arg5[%c0_21, %c0_22, %c0_23] : memref<1x128x128xf32, #tpu.memory_space<vmem>>, vector<1x128x128xf32>
    tpu.vector_store %arg5[%c0_21, %c0_22, %c0_23], %103 {strides = array<i32>} : memref<1x128x128xf32, #tpu.memory_space<vmem>>, vector<1x128x128xf32>,
    %105 = tpu.iota {dimensions = array<i32: 2>} : vector<1x1x128xi32>
    %cst_24 = arith.constant dense<true> : vector<1x1x128xi1>
    %106 = arith.xori %40, %cst_24 : vector<1x1x128xi1>
    %107 = arith.extui %106 : vector<1x1x128xi1> to vector<1x1x128xi32>
    %108 = arith.sitofp %107 : vector<1x1x128xi32> to vector<1x1x128xf32>
    %cst_25 = arith.constant 0.000000e+00 : f32
    %109 = vector.broadcast %cst_25 : f32 to vector<1x1x128xf32>
    %cst_26 = arith.constant 0.000000e+00 : f32
    %110 = vector.broadcast %cst_26 : f32 to vector<1x1x128xf32>
    %cst_27 = arith.constant 0.000000e+00 : f32
    %111 = vector.broadcast %cst_27 : f32 to vector<1x1x1xf32>
    %112 = vector.extract_strided_slice %108 {offsets = [0, 0, 0], sizes = [1, 1, 1], strides = [1, 1, 1]} : vector<1x1x128xf32> to vector<1x1x1xf32>
    %cst_28 = arith.constant 5.000000e-01 : f32
    %113 = vector.broadcast %cst_28 : f32 to vector<1x1x1xf32>
    %114 = arith.cmpf olt, %112, %113 : vector<1x1x1xf32>
    %115 = arith.extui %114 : vector<1x1x1xi1> to vector<1x1x1xi32>
    %116 = arith.sitofp %115 : vector<1x1x1xi32> to vector<1x1x1xf32>
    %c0_i32_29 = arith.constant 0 : i32
    %117 = vector.broadcast %c0_i32_29 : i32 to vector<1x1x128xi32>
    %118 = arith.cmpi eq, %105, %117 : vector<1x1x128xi32>
    %119 = arith.extui %118 : vector<1x1x128xi1> to vector<1x1x128xi32>
    %120 = arith.sitofp %119 : vector<1x1x128xi32> to vector<1x1x128xf32>
    %121 = vector.broadcast %116 : vector<1x1x1xf32> to vector<1x1x128xf32>
    %122 = arith.mulf %121, %120 : vector<1x1x128xf32>
    %123 = arith.addf %109, %122 : vector<1x1x128xf32>
    %124 = arith.mulf %116, %111 : vector<1x1x1xf32>
    %125 = vector.broadcast %124 : vector<1x1x1xf32> to vector<1x1x128xf32>
    %126 = arith.mulf %125, %120 : vector<1x1x128xf32>
    %127 = arith.addf %110, %126 : vector<1x1x128xf32>
    %128 = arith.addf %111, %116 : vector<1x1x1xf32>
    %c0_30 = arith.constant 0 : index
    %c0_31 = arith.constant 0 : index
    %c0_32 = arith.constant 0 : index
    %129 = vector.load %arg5[%c0_30, %c0_31, %c0_32] : memref<1x128x128xf32, #tpu.memory_space<vmem>>, vector<1x1x128xf32>
    %130 = vector.broadcast %116 : vector<1x1x1xf32> to vector<1x1x128xf32>
    %131 = arith.mulf %130, %129 : vector<1x1x128xf32>
    %132 = arith.maximumf %108, %131 : vector<1x1x128xf32>
    %133 = vector.extract_strided_slice %132 {offsets = [0, 0, 1], sizes = [1, 1, 1], strides = [1, 1, 1]} : vector<1x1x128xf32> to vector<1x1x1xf32>
    %cst_33 = arith.constant 5.000000e-01 : f32
    %134 = vector.broadcast %cst_33 : f32 to vector<1x1x1xf32>
    %135 = arith.cmpf olt, %133, %134 : vector<1x1x1xf32>
    %136 = arith.extui %135 : vector<1x1x1xi1> to vector<1x1x1xi32>
    %137 = arith.sitofp %136 : vector<1x1x1xi32> to vector<1x1x1xf32>
    %c1_i32_34 = arith.constant 1 : i32
    %138 = vector.broadcast %c1_i32_34 : i32 to vector<1x1x128xi32>
    %139 = arith.cmpi eq, %105, %138 : vector<1x1x128xi32>
    %140 = arith.extui %139 : vector<1x1x128xi1> to vector<1x1x128xi32>
    %141 = arith.sitofp %140 : vector<1x1x128xi32> to vector<1x1x128xf32>
    %142 = vector.broadcast %137 : vector<1x1x1xf32> to vector<1x1x128xf32>
    %143 = arith.mulf %142, %141 : vector<1x1x128xf32>
    %144 = arith.addf %123, %143 : vector<1x1x128xf32>
    %145 = arith.mulf %137, %128 : vector<1x1x1xf32>
    %146 = vector.broadcast %145 : vector<1x1x1xf32> to vector<1x1x128xf32>
    %147 = arith.mulf %146, %141 : vector<1x1x128xf32>
    %148 = arith.addf %127, %147 : vector<1x1x128xf32>
    %149 = arith.addf %128, %137 : vector<1x1x1xf32>
    %c0_35 = arith.constant 0 : index
    %c1 = arith.constant 1 : index
    %c0_36 = arith.constant 0 : index
    %150 = vector.load %arg5[%c0_35, %c1, %c0_36] : memref<1x128x128xf32, #tpu.memory_space<vmem>>, vector<1x1x128xf32>
    %151 = vector.broadcast %137 : vector<1x1x1xf32> to vector<1x1x128xf32>
    %152 = arith.mulf %151, %150 : vector<1x1x128xf32>
    %153 = arith.maximumf %132, %152 : vector<1x1x128xf32>
    %154 = vector.extract_strided_slice %153 {offsets = [0, 0, 2], sizes = [1, 1, 1], strides = [1, 1, 1]} : vector<1x1x128xf32> to vector<1x1x1xf32>
    %cst_37 = arith.constant 5.000000e-01 : f32
    %155 = vector.broadcast %cst_37 : f32 to vector<1x1x1xf32>
    %156 = arith.cmpf olt, %154, %155 : vector<1x1x1xf32>
    %157 = arith.extui %156 : vector<1x1x1xi1> to vector<1x1x1xi32>
    %158 = arith.sitofp %157 : vector<1x1x1xi32> to vector<1x1x1xf32>
    %c2_i32 = arith.constant 2 : i32
    %159 = vector.broadcast %c2_i32 : i32 to vector<1x1x128xi32>
    %160 = arith.cmpi eq, %105, %159 : vector<1x1x128xi32>
    %161 = arith.extui %160 : vector<1x1x128xi1> to vector<1x1x128xi32>
    %162 = arith.sitofp %161 : vector<1x1x128xi32> to vector<1x1x128xf32>
    %163 = vector.broadcast %158 : vector<1x1x1xf32> to vector<1x1x128xf32>
    %164 = arith.mulf %163, %162 : vector<1x1x128xf32>
    %165 = arith.addf %144, %164 : vector<1x1x128xf32>
    %166 = arith.mulf %158, %149 : vector<1x1x1xf32>
    %167 = vector.broadcast %166 : vector<1x1x1xf32> to vector<1x1x128xf32>
    %168 = arith.mulf %167, %162 : vector<1x1x128xf32>
    %169 = arith.addf %148, %168 : vector<1x1x128xf32>
    %170 = arith.addf %149, %158 : vector<1x1x1xf32>
    %c0_38 = arith.constant 0 : index
    %c2 = arith.constant 2 : index
    %c0_39 = arith.constant 0 : index
    %171 = vector.load %arg5[%c0_38, %c2, %c0_39] : memref<1x128x128xf32, #tpu.memory_space<vmem>>, vector<1x1x128xf32>
    %172 = vector.broadcast %158 : vector<1x1x1xf32> to vector<1x1x128xf32>
    %173 = arith.mulf %172, %171 : vector<1x1x128xf32>
    %174 = arith.maximumf %153, %173 : vector<1x1x128xf32>
    %175 = vector.extract_strided_slice %174 {offsets = [0, 0, 3], sizes = [1, 1, 1], strides = [1, 1, 1]} : vector<1x1x128xf32> to vector<1x1x1xf32>
    %cst_40 = arith.constant 5.000000e-01 : f32
    %176 = vector.broadcast %cst_40 : f32 to vector<1x1x1xf32>
    %177 = arith.cmpf olt, %175, %176 : vector<1x1x1xf32>
    %178 = arith.extui %177 : vector<1x1x1xi1> to vector<1x1x1xi32>
    %179 = arith.sitofp %178 : vector<1x1x1xi32> to vector<1x1x1xf32>
    %c3_i32 = arith.constant 3 : i32
    %180 = vector.broadcast %c3_i32 : i32 to vector<1x1x128xi32>
    %181 = arith.cmpi eq, %105, %180 : vector<1x1x128xi32>
    %182 = arith.extui %181 : vector<1x1x128xi1> to vector<1x1x128xi32>
    %183 = arith.sitofp %182 : vector<1x1x128xi32> to vector<1x1x128xf32>
    %184 = vector.broadcast %179 : vector<1x1x1xf32> to vector<1x1x128xf32>
    %185 = arith.mulf %184, %183 : vector<1x1x128xf32>
    %186 = arith.addf %165, %185 : vector<1x1x128xf32>
    %187 = arith.mulf %179, %170 : vector<1x1x1xf32>
    %188 = vector.broadcast %187 : vector<1x1x1xf32> to vector<1x1x128xf32>
    %189 = arith.mulf %188, %183 : vector<1x1x128xf32>
    %190 = arith.addf %169, %189 : vector<1x1x128xf32>
    %191 = arith.addf %170, %179 : vector<1x1x1xf32>
    %c0_41 = arith.constant 0 : index
    %c3 = arith.constant 3 : index
    %c0_42 = arith.constant 0 : index
    %192 = vector.load %arg5[%c0_41, %c3, %c0_42] : memref<1x128x128xf32, #tpu.memory_space<vmem>>, vector<1x1x128xf32>
    %193 = vector.broadcast %179 : vector<1x1x1xf32> to vector<1x1x128xf32>
    %194 = arith.mulf %193, %192 : vector<1x1x128xf32>
    %195 = arith.maximumf %174, %194 : vector<1x1x128xf32>
    %196 = vector.extract_strided_slice %195 {offsets = [0, 0, 4], sizes = [1, 1, 1], strides = [1, 1, 1]} : vector<1x1x128xf32> to vector<1x1x1xf32>
    %cst_43 = arith.constant 5.000000e-01 : f32
    %197 = vector.broadcast %cst_43 : f32 to vector<1x1x1xf32>
    %198 = arith.cmpf olt, %196, %197 : vector<1x1x1xf32>
    %199 = arith.extui %198 : vector<1x1x1xi1> to vector<1x1x1xi32>
    %200 = arith.sitofp %199 : vector<1x1x1xi32> to vector<1x1x1xf32>
    %c4_i32 = arith.constant 4 : i32
    %201 = vector.broadcast %c4_i32 : i32 to vector<1x1x128xi32>
    %202 = arith.cmpi eq, %105, %201 : vector<1x1x128xi32>
    %203 = arith.extui %202 : vector<1x1x128xi1> to vector<1x1x128xi32>
    %204 = arith.sitofp %203 : vector<1x1x128xi32> to vector<1x1x128xf32>
    %205 = vector.broadcast %200 : vector<1x1x1xf32> to vector<1x1x128xf32>
    %206 = arith.mulf %205, %204 : vector<1x1x128xf32>
    %207 = arith.addf %186, %206 : vector<1x1x128xf32>
    %208 = arith.mulf %200, %191 : vector<1x1x1xf32>
    %209 = vector.broadcast %208 : vector<1x1x1xf32> to vector<1x1x128xf32>
    %210 = arith.mulf %209, %204 : vector<1x1x128xf32>
    %211 = arith.addf %190, %210 : vector<1x1x128xf32>
    %212 = arith.addf %191, %200 : vector<1x1x1xf32>
    %c0_44 = arith.constant 0 : index
    %c4 = arith.constant 4 : index
    %c0_45 = arith.constant 0 : index
    %213 = vector.load %arg5[%c0_44, %c4, %c0_45] : memref<1x128x128xf32, #tpu.memory_space<vmem>>, vector<1x1x128xf32>
    %214 = vector.broadcast %200 : vector<1x1x1xf32> to vector<1x1x128xf32>
    %215 = arith.mulf %214, %213 : vector<1x1x128xf32>
    %216 = arith.maximumf %195, %215 : vector<1x1x128xf32>
    %217 = vector.extract_strided_slice %216 {offsets = [0, 0, 5], sizes = [1, 1, 1], strides = [1, 1, 1]} : vector<1x1x128xf32> to vector<1x1x1xf32>
    %cst_46 = arith.constant 5.000000e-01 : f32
    %218 = vector.broadcast %cst_46 : f32 to vector<1x1x1xf32>
    %219 = arith.cmpf olt, %217, %218 : vector<1x1x1xf32>
    %220 = arith.extui %219 : vector<1x1x1xi1> to vector<1x1x1xi32>
    %221 = arith.sitofp %220 : vector<1x1x1xi32> to vector<1x1x1xf32>
    %c5_i32 = arith.constant 5 : i32
    %222 = vector.broadcast %c5_i32 : i32 to vector<1x1x128xi32>
    %223 = arith.cmpi eq, %105, %222 : vector<1x1x128xi32>
    %224 = arith.extui %223 : vector<1x1x128xi1> to vector<1x1x128xi32>
    %225 = arith.sitofp %224 : vector<1x1x128xi32> to vector<1x1x128xf32>
    %226 = vector.broadcast %221 : vector<1x1x1xf32> to vector<1x1x128xf32>
    %227 = arith.mulf %226, %225 : vector<1x1x128xf32>
    %228 = arith.addf %207, %227 : vector<1x1x128xf32>
    %229 = arith.mulf %221, %212 : vector<1x1x1xf32>
    %230 = vector.broadcast %229 : vector<1x1x1xf32> to vector<1x1x128xf32>
    %231 = arith.mulf %230, %225 : vector<1x1x128xf32>
    %232 = arith.addf %211, %231 : vector<1x1x128xf32>
    %233 = arith.addf %212, %221 : vector<1x1x1xf32>
    %c0_47 = arith.constant 0 : index
    %c5 = arith.constant 5 : index
    %c0_48 = arith.constant 0 : index
    %234 = vector.load %arg5[%c0_47, %c5, %c0_48] : memref<1x128x128xf32, #tpu.memory_space<vmem>>, vector<1x1x128xf32>
    %235 = vector.broadcast %221 : vector<1x1x1xf32> to vector<1x1x128xf32>
    %236 = arith.mulf %235, %234 : vector<1x1x128xf32>
    %237 = arith.maximumf %216, %236 : vector<1x1x128xf32>
    %238 = vector.extract_strided_slice %237 {offsets = [0, 0, 6], sizes = [1, 1, 1], strides = [1, 1, 1]} : vector<1x1x128xf32> to vector<1x1x1xf32>
    %cst_49 = arith.constant 5.000000e-01 : f32
    %239 = vector.broadcast %cst_49 : f32 to vector<1x1x1xf32>
    %240 = arith.cmpf olt, %238, %239 : vector<1x1x1xf32>
    %241 = arith.extui %240 : vector<1x1x1xi1> to vector<1x1x1xi32>
    %242 = arith.sitofp %241 : vector<1x1x1xi32> to vector<1x1x1xf32>
    %c6_i32 = arith.constant 6 : i32
    %243 = vector.broadcast %c6_i32 : i32 to vector<1x1x128xi32>
    %244 = arith.cmpi eq, %105, %243 : vector<1x1x128xi32>
    %245 = arith.extui %244 : vector<1x1x128xi1> to vector<1x1x128xi32>
    %246 = arith.sitofp %245 : vector<1x1x128xi32> to vector<1x1x128xf32>
    %247 = vector.broadcast %242 : vector<1x1x1xf32> to vector<1x1x128xf32>
    %248 = arith.mulf %247, %246 : vector<1x1x128xf32>
    %249 = arith.addf %228, %248 : vector<1x1x128xf32>
    %250 = arith.mulf %242, %233 : vector<1x1x1xf32>
    %251 = vector.broadcast %250 : vector<1x1x1xf32> to vector<1x1x128xf32>
    %252 = arith.mulf %251, %246 : vector<1x1x128xf32>
    %253 = arith.addf %232, %252 : vector<1x1x128xf32>
    %254 = arith.addf %233, %242 : vector<1x1x1xf32>
    %c0_50 = arith.constant 0 : index
    %c6 = arith.constant 6 : index
    %c0_51 = arith.constant 0 : index
    %255 = vector.load %arg5[%c0_50, %c6, %c0_51] : memref<1x128x128xf32, #tpu.memory_space<vmem>>, vector<1x1x128xf32>
    %256 = vector.broadcast %242 : vector<1x1x1xf32> to vector<1x1x128xf32>
    %257 = arith.mulf %256, %255 : vector<1x1x128xf32>
    %258 = arith.maximumf %237, %257 : vector<1x1x128xf32>
    %259 = vector.extract_strided_slice %258 {offsets = [0, 0, 7], sizes = [1, 1, 1], strides = [1, 1, 1]} : vector<1x1x128xf32> to vector<1x1x1xf32>
    %cst_52 = arith.constant 5.000000e-01 : f32
    %260 = vector.broadcast %cst_52 : f32 to vector<1x1x1xf32>
    %261 = arith.cmpf olt, %259, %260 : vector<1x1x1xf32>
    %262 = arith.extui %261 : vector<1x1x1xi1> to vector<1x1x1xi32>
    %263 = arith.sitofp %262 : vector<1x1x1xi32> to vector<1x1x1xf32>
    %c7_i32 = arith.constant 7 : i32
    %264 = vector.broadcast %c7_i32 : i32 to vector<1x1x128xi32>
    %265 = arith.cmpi eq, %105, %264 : vector<1x1x128xi32>
    %266 = arith.extui %265 : vector<1x1x128xi1> to vector<1x1x128xi32>
    %267 = arith.sitofp %266 : vector<1x1x128xi32> to vector<1x1x128xf32>
    %268 = vector.broadcast %263 : vector<1x1x1xf32> to vector<1x1x128xf32>
    %269 = arith.mulf %268, %267 : vector<1x1x128xf32>
    %270 = arith.addf %249, %269 : vector<1x1x128xf32>
    %271 = arith.mulf %263, %254 : vector<1x1x1xf32>
    %272 = vector.broadcast %271 : vector<1x1x1xf32> to vector<1x1x128xf32>
    %273 = arith.mulf %272, %267 : vector<1x1x128xf32>
    %274 = arith.addf %253, %273 : vector<1x1x128xf32>
    %275 = arith.fptosi %274 : vector<1x1x128xf32> to vector<1x1x128xi32>
    %276 = tpu.iota {dimensions = array<i32: 1>} : vector<1x4x128xi32>
    %277 = vector.broadcast %275 : vector<1x1x128xi32> to vector<1x4x128xi32>
    %278 = arith.cmpi eq, %276, %277 : vector<1x4x128xi32>
    %cst_53 = arith.constant 5.000000e-01 : f32
    %279 = vector.broadcast %cst_53 : f32 to vector<1x1x128xf32>
    %280 = arith.cmpf ogt, %270, %279 : vector<1x1x128xf32>
    %281 = vector.broadcast %280 : vector<1x1x128xi1> to vector<1x4x128xi1>
    %282 = arith.andi %278, %281 : vector<1x4x128xi1>
    %283 = arith.extui %282 : vector<1x4x128xi1> to vector<1x4x128xi32>
    %284 = arith.sitofp %283 : vector<1x4x128xi32> to vector<1x4x128xf32>
    "tpu.trace_start"() <{level = 10 : i32, message = "bmk,bkc->bmc"}> : () -> ()
    %cst_54 = arith.constant dense<0.000000e+00> : vector<1x4x8xf32>
    %285 = tpu.matmul %284, %43, %cst_54 {dimension_numbers = #tpu.dot_dimension_numbers<[2], [1], [1], [2], [0, 0, 0, 1, 1, 2], [0], [0]>} : vector<1x4x128xf32>, vector<1x128x8xf32>, vector<1x4x8xf32> -> vector<1x4x8xf32>
    "tpu.trace_stop"() : () -> ()
    %286 = vector.extract_strided_slice %285 {offsets = [0, 0, 7], sizes = [1, 4, 1], strides = [1, 1, 1]} : vector<1x4x8xf32> to vector<1x4x1xf32>
    %cst_55 = arith.constant 5.000000e-01 : f32
    %287 = vector.broadcast %cst_55 : f32 to vector<1x4x1xf32>
    %288 = arith.cmpf ogt, %286, %287 : vector<1x4x1xf32>
    %cst_56 = arith.constant -1.000000e+00 : f32
    %289 = vector.shape_cast %288 : vector<1x4x1xi1> to vector<1x4x1xi1>
    %290 = vector.broadcast %289 : vector<1x4x1xi1> to vector<1x4x8xi1>
    %291 = vector.broadcast %cst_56 : f32 to vector<1x4x8xf32>
    %292 = arith.select %290, %285, %291 : vector<1x4x8xi1>, vector<1x4x8xf32>
    %c0_57 = arith.constant 0 : index
    %c0_58 = arith.constant 0 : index
    %c0_59 = arith.constant 0 : index
    %293 = vector.load %arg4[%c0_57, %c0_58, %c0_59] : memref<1x4x8xf32, #tpu.memory_space<vmem>>, vector<1x4x8xf32>
    tpu.vector_store %arg4[%c0_57, %c0_58, %c0_59], %292 {strides = array<i32>} : memref<1x4x8xf32, #tpu.memory_space<vmem>>, vector<1x4x8xf32>,
    return
  }
  func.func @transform_0(%arg0: i32) -> (i32, i32, i32) {
    %c0_i32 = arith.constant 0 : i32
    %c0_i32_0 = arith.constant 0 : i32
    %c0_i32_1 = arith.constant 0 : i32
    return %arg0, %c0_i32, %c0_i32_0 : i32, i32, i32
  }
  func.func @transform_1(%arg0: i32) -> (i32, i32, i32) {
    %c0_i32 = arith.constant 0 : i32
    %c0_i32_0 = arith.constant 0 : i32
    %c0_i32_1 = arith.constant 0 : i32
    return %arg0, %c0_i32, %c0_i32_0 : i32, i32, i32
  }
  func.func @transform_2(%arg0: i32) -> (i32, i32, i32) {
    %c0_i32 = arith.constant 0 : i32
    %c0_i32_0 = arith.constant 0 : i32
    %c0_i32_1 = arith.constant 0 : i32
    return %arg0, %c0_i32, %c0_i32_0 : i32, i32, i32
  }
  func.func @transform_3(%arg0: i32) -> (i32, i32, i32) {
    %c0_i32 = arith.constant 0 : i32
    %c0_i32_0 = arith.constant 0 : i32
    %c0_i32_1 = arith.constant 0 : i32
    return %arg0, %c0_i32, %c0_i32_0 : i32, i32, i32
  }
}

</mosaic_0001>

<bundles_post_ra>
// kernel: forward.1
= control target key start
LH: loop header
LB: loop body
LE: loop exit
PB: predicated region body
PF: predicated region fallthrough
CT: control target
= control target key end

     0   :  { %s2053_s12 = smov 0   ;;  %s2672_s0 = inlined_call_operand.vmem [shape: f32[2,1,128], index: 0, kind: input, shape index: {}]   ;;  %s2673_s1 = inlined_call_operand.vmem [shape: f32[2,6,128], index: 1, kind: input, shape index: {}]   ;;  %s2674_s2 = inlined_call_operand.vmem [shape: f32[2,6,128], index: 2, kind: input, shape index: {}]   ;;  %s2675_s3 = inlined_call_operand.vmem [shape: f32[2,4,8], index: 3, kind: output, shape index: {}]  }
   0x1 LB: > { %s1800_s13 = sadd.s32 4294967295, %s2005_s12   ;;  %p1804_p0 = scmp.ge.s32.totalorder %s2005_s12, 1  ;;  %s2005_s12 = sphi %s2053_s12, %s13_s12  }
   0x2   : > { %p153_p1 = scmp.lt.s32.totalorder %s2005_s12, 3 }
   0x4   : > { %p154_p2 = pnand %p1804_p0, %p153_p1 }
   0x6   : > { %157 = sbr.rel (%p154_p2) target bundleno = 1965 (0x7ad), region = 32 }
   0xd   : > { %p182_p3 = scmp.lt.s32.totalorder %s1800_s13, 1  ;;  %v231_v4 = vlaneseq  ;;  %vm236_vm0 = vcmask 1042432   ;;  %vm238_vm1 = vcmask 1045504   ;;  %vm240_vm2 = vcmask 1046528   ;;  %s2009_s24 = smov 3  }
   0xe   : > { %v2007_v23 = vmov 0.0|0.0   ;;  %v2688_v24 = vmov 0   ;;  %v2676_v32 = vmov 5   ;;  %s2011_s25 = smov 127   ;;  %s2012_s26 = smov 126   ;;  %v2686_v52 = vmov 3  }
   0xf   : > { %s2774_s13 = smov (!%p182_p3, %s1800_s13), 1  ;;  %v2071_v8 = vshrl.u32 %v231_v4, 7  ;;  %1897 = vmatprep.subr.bf16.mxu0 %v2007_v23  ;;  %1957 = vset.pattern.permute.xlu1 %v2688_v24  ;;  %v2682_v53 = vmov 1   ;;  %v2680_v54 = vmov 4   ;;  %v2684_v55 = vmov 2   ;;  %s2019_s27 = smov 125  }
  0x10   : > { %s1805_s14 = sshll.u32 %s2774_s13, 3  ;;  %s184_s23 = scalar_lea.vmem %s2672_s0, %s2774_s13  ;;  %vm2017_vm6 = vmmov 1   ;;  %v2678_v63 = vmov 0.0  }
  0x11   : > { %s188_s17 = scalar_lea.vmem %s2673_s1, %s1805_s14  ;;  %s192_s20 = scalar_lea.vmem %s2674_s2, %s1805_s14  ;;  %v2078_v12 = vsub.s32 0, %v2071_v8  ;;  %v2080_v13 = vld [vmem:[%s184_s23] sm:$0x1] }
  0x12   : > { %v198_v0 = vld [vmem:[%s188_s17] sm:$0x3f]  ;;  %vm224_vm3 = vcmp.gt.f32.partialorder %v2080_v13, 0.3  ;;  %s2020_s28 = smov 124   ;;  %s2021_s29 = smov 123  }
  0x13   : > { %v205_v1 = vmul.f32 1.442695, %v198_v0  ;;  %v199_v2 = vld [vmem:[%s192_s20] sm:$0x3f]  ;;  %v234_v18 = vrot.slane %v2080_v13, %v2078_v12  ;;  %s2022_s30 = smov 1   ;;  %s2023_s4 = smov 122  }
  0x14   : > { %v201_v3 = vrot.slane %v199_v2, 3  ;;  %s2025_s5 = smov 2   ;;  %s2026_s6 = smov 4  }
  0x15   : > { %1997 = vpow2.f32 %v205_v1  ;;  %s2027_s7 = smov 5   ;;  %s2028_s8 = smov 6  }
  0x16   : > { %v203_v5 = vmul.f32 %v201_v3, %v198_v0  ;;  %s2029_s9 = smov 7   ;;  %s1807_s10 = sshll.u32 %s2774_s13, 2 }
  0x17   : > { %s196_s15 = scalar_lea.vmem %s2675_s3, %s1807_s10 }
  0x18   : > { %v204_v9 = vadd.f32 %v203_v5, %v199_v2 }
  0x1f   : > { %v1998_v6 = vpop.eup %1997 }
  0x20   : > { %v207_v7 = vmul.f32 %v1998_v6, %v199_v2 }
  0x22   : > { %v208_v10 = vmul.f32 0.5, %v207_v7 }
  0x24   : > { %v210_v11 = vrot.slane %v208_v10, 3 }
  0x26   : > { %v212_v14 = vsub.f32 %v204_v9, %v210_v11  ;;  %v214_v15 = vadd.f32 %v210_v11, %v204_v9  ;;  %v764_v11 = vsub.s32 1, %v2071_v8 }
  0x28   : > { %v2082_v16 = vmax.f32 %v212_v14, 0.0  ;;  %v2084_v17 = vmin.f32 %v214_v15, 15.0  ;;  %v980_v14 = vsub.s32 2, %v2071_v8 }
  0x2a   : > { %v228_v19 = vrot.slane %v2084_v17, 5  ;;  %v216_v56 = vsub.f32 %v2084_v17, %v2082_v16  ;;  %v849_v13 = vrot.slane %v2084_v17, %v764_v11  ;;  %v649_v15 = vrot.slane %v2084_v17, %v2078_v12 }
  0x2c   : > { %v237_v20 = vsel %vm236_vm0, %v2082_v16, %v228_v19  ;;  %v218_v57 = vrot.slane %v216_v56, 1  ;;  %v221_v59 = vrot.slane %v216_v56, 2  ;;  %v1065_v19 = vrot.slane %v2084_v17, %v980_v14 }
  0x2d   : > { %v239_v21 = vsel %vm238_vm1, %v237_v20, %v234_v18  ;;  %v765_v18 = vrot.slane %v2082_v16, %v764_v11 }
  0x2e   : > { %v241_v22 = vsel %vm240_vm2, %v239_v21, 1.0  ;;  %v220_v58 = vmul.f32 %v218_v57, %v216_v56  ;;  %v565_v21 = vrot.slane %v2082_v16, %v2078_v12 }
  0x2f   : > { %242 = vxpose.xlu0.b32.start.end [1/1] (short) %v241_v22, 128  ;;  %v981_v22 = vrot.slane %v2082_v16, %v980_v14 }
  0x30   : > { %v223_v60 = vmul.f32 %v221_v59, %v220_v58 }
  0x32   : > { %vm225_vm4 = vcmp.gt.f32.partialorder %v223_v60, 0.5 }
  0x33   : > { %vm226_vm5 = vmand %vm224_vm3, %vm225_vm4 }
  0x34   : > { %vm1328_vm7 = vmxor %vm226_vm5, %vm2017_vm6 }
  0x35   : > { %v1824_v0 = vsel %vm1328_vm7, 1.0, %v2678_v63 }
  0x36   : > { %vm1331_vm8 = vcmp.lt.f32.partialorder %v1824_v0, 0.5 }
  0x37   : > { %v2164_v3 = vsel %vm1331_vm8, 1.0, %v2678_v63  ;;  %vm2031_vm8 = vmmov 0  }
  0x58   : > { %1969 = vset.pattern.permute.xlu0 %v2676_v32 }
  0xaf   : > { %v2091_v25 = vpop.trf.xlu0 }
  0xb0   : > { %290 = vrot.lane.b32.xlu0 %v2091_v25, %s2009_s24 }
  0xb3   : > { %v2095_v26 = vpop.trf.xlu0 }
  0xb4   : > { %v1898_v27 = vpack.c.bf16 %v2095_v26, %v2091_v25 }
  0xb6   : > { %1899 = vmatpush3.bf16.msra.mxu0 %v1898_v27 }
  0xb7   : > { %v2099_v28 = vpop.trf.xlu0  ;;  %1900 = vmatprep.subr.bf16.mxu0 %v2007_v23 }
  0xbb   : > { %v2101_v29 = vpop.trf.xlu0 }
  0xbc   : > { %v1901_v30 = vpack.c.bf16 %v2101_v29, %v2099_v28 }
  0xbe   : > { %1902 = vmatpush3.bf16.msra.mxu0 %v1901_v30 }
  0xbf   : > { %v2105_v31 = vpop.trf.xlu0  ;;  %1903 = vmatprep.subr.bf16.mxu0 %v2007_v23 }
  0xc3   : > { %v2108_v33 = vpop.trf.xlu0 }
  0xc4   : > { %v1904_v34 = vpack.c.bf16 %v2108_v33, %v2105_v31 }
  0xc6   : > { %1905 = vmatpush3.bf16.msra.mxu0 %v1904_v34 }
  0xc7   : > { %v2112_v35 = vpop.trf.xlu0  ;;  %1906 = vmatprep.subr.bf16.mxu0 %v2007_v23 }
  0xcb   : > { %v2114_v36 = vpop.trf.xlu0 }
  0xcc   : > { %v1907_v37 = vpack.c.bf16 %v2114_v36, %v2112_v35 }
  0xce   : > { %1908 = vmatpush3.bf16.msra.mxu0 %v1907_v37 }
  0xcf   : > { %v2118_v38 = vpop.trf.xlu0  ;;  %1909 = vmatprep.subr.bf16.mxu0 %v2007_v23 }
  0xd3   : > { %v2120_v39 = vpop.trf.xlu0 }
  0xd4   : > { %v1910_v40 = vpack.c.bf16 %v2120_v39, %v2118_v38 }
  0xd6   : > { %1911 = vmatpush3.bf16.msra.mxu0 %v1910_v40 }
  0xd7   : > { %v2124_v41 = vpop.trf.xlu0  ;;  %1912 = vmatprep.subr.bf16.mxu0 %v2007_v23 }
  0xdb   : > { %v2126_v42 = vpop.trf.xlu0 }
  0xdc   : > { %v1913_v43 = vpack.c.bf16 %v2126_v42, %v2124_v41 }
  0xde   : > { %1914 = vmatpush3.bf16.msra.mxu0 %v1913_v43 }
  0xdf   : > { %v2130_v44 = vpop.trf.xlu0  ;;  %1915 = vmatprep.subr.bf16.mxu0 %v2007_v23 }
  0xe3   : > { %v2132_v45 = vpop.trf.xlu0 }
  0xe4   : > { %v1916_v46 = vpack.c.bf16 %v2132_v45, %v2130_v44 }
  0xe6   : > { %1917 = vmatpush3.bf16.msra.mxu0 %v1916_v46 }
  0xe7   : > { %v2136_v47 = vpop.trf.xlu0  ;;  %1918 = vmatprep.subr.bf16.mxu0 %v2007_v23 }
  0xe8   : > { %318 = vrot.lane.b32.xlu0 %v2136_v47, %s2009_s24 }
  0xeb   : > { %v2140_v48 = vpop.trf.xlu0 }
  0xec   : > { %v1919_v49 = vpack.c.bf16 %v2140_v48, %v2136_v47 }
  0xee   : > { %1920 = vmatpush3.bf16.msra.mxu0 %v1919_v49 }
 0x122   : > { %v291_v50 = vpop.permute.xlu0 %290 }
 0x123   : > { %v338_v51 = vsub.f32 %v2091_v25, %v291_v50  ;;  %v1213_v50 = vrot.slane %v223_v60, %v2078_v12 }
 0x125   : > { %370 = vrot.lane.b32.xlu1 %v338_v51, %s2011_s25 }
 0x129   : > { %434 = vrot.lane.b32.xlu1 %v338_v51, %s2012_s26 }
 0x12d   : > { %499 = vperm.xlu1 %1957, %v2091_v25  }
 0x131   : > { %1958 = vset.pattern.permute.xlu1 %v2686_v52 }
 0x132   : > { %583 = vperm.xlu1 %1958, %v2091_v25  }
 0x136   : > { %1959 = vset.pattern.permute.xlu1 %v2682_v53 }
 0x137   : > { %699 = vperm.xlu1 %1959, %v2091_v25  }
 0x13b   : > { %1960 = vset.pattern.permute.xlu1 %v2680_v54 }
 0x13c   : > { %783 = vperm.xlu1 %1960, %v2091_v25  }
 0x140   : > { %1961 = vset.pattern.permute.xlu1 %v2684_v55 }
 0x141   : > { %915 = vperm.xlu1 %1961, %v2091_v25  }
 0x145   : > { %1962 = vset.pattern.permute.xlu1 %v2676_v32 }
 0x146   : > { %999 = vperm.xlu1 %1962, %v2091_v25  }
 0x14a   : > { %1963 = vset.pattern.permute.xlu1 %v2686_v52 }
 0x197   : > { %v371_v61 = vpop.permute.xlu1 %370 }
 0x198   : > { %v418_v62 = vmul.f32 %v371_v61, %v338_v51 }
 0x19b   : > { %v435_v1 = vpop.permute.xlu1 %434 }
 0x19c   : > { %v482_v2 = vmul.f32 %v435_v1, %v418_v62 }
 0x19e   : > { %1132 = vperm.xlu1 %1963, %v482_v2  }
 0x1a2   : > { %1964 = vset.pattern.permute.xlu1 %v2688_v24 }
 0x1a3   : > { %1339 = vperm.xlu1 %1964, %v2164_v3  }
 0x1a7   : > { %1965 = vset.pattern.permute.xlu1 %v2682_v53 }
 0x1ac   : > { %v500_v5 = vpop.permute.xlu1 %499 }
 0x1ad   : > { %v566_v34 = vmax.f32 %v500_v5, %v565_v21 }
 0x1b1   : > { %v584_v6 = vpop.permute.xlu1 %583 }
 0x1b2   : > { %v650_v25 = vmin.f32 %v584_v6, %v649_v15 }
 0x1b4   : > { %v666_v43 = vsub.f32 %v650_v25, %v566_v34 }
 0x1b6   : > { %v700_v7 = vpop.permute.xlu1 %699  ;;  %v682_v51 = vmax.f32 %v666_v43, 0.0 }
 0x1b7   : > { %v766_v27 = vmax.f32 %v700_v7, %v765_v18 }
 0x1bb   : > { %v784_v9 = vpop.permute.xlu1 %783 }
 0x1bc   : > { %v850_v23 = vmin.f32 %v784_v9, %v849_v13  ;;  %v2188_v9 = vand.u32 127, %v231_v4 }
 0x1be   : > { %v866_v37 = vsub.f32 %v850_v23, %v766_v27  ;;  %vm1334_vm11 = vcmp.eq.s32.totalorder %v2188_v9, 0  ;;  %vm1367_vm12 = vcmp.eq.s32.totalorder %v2188_v9, 1  ;;  %vm1407_vm14 = vcmp.eq.s32.totalorder %v2188_v9, 2 }
 0x1bf   : > { %vm1447_vm0 = vcmp.eq.s32.totalorder %v2188_v9, 3  ;;  %vm1487_vm2 = vcmp.eq.s32.totalorder %v2188_v9, 4  ;;  %vm1527_vm4 = vcmp.eq.s32.totalorder %v2188_v9, 5  ;;  %vm1567_vm6 = vcmp.eq.s32.totalorder %v2188_v9, 6 }
 0x1c0   : > { %v916_v10 = vpop.permute.xlu1 %915  ;;  %v882_v49 = vmax.f32 %v866_v37, 0.0 }
 0x1c1   : > { %v982_v40 = vmax.f32 %v916_v10, %v981_v22  ;;  %v2193_v10 = vsel %vm1334_vm11, 1.0, %v2678_v63  ;;  %v2208_v22 = vsel %vm1407_vm14, 1.0, %v2678_v63  ;;  %vm1724_vm14 = vcmask 60416  }
 0x1c2   : > { %v898_v56 = vmul.f32 %v882_v49, %v682_v51  ;;  %v2219_v49 = vsel %vm1447_vm0, 1.0, %v2678_v63 }
 0x1c5   : > { %v1000_v20 = vpop.permute.xlu1 %999 }
 0x1c6   : > { %v1066_v30 = vmin.f32 %v1000_v20, %v1065_v19 }
 0x1c8   : > { %v1082_v46 = vsub.f32 %v1066_v30, %v982_v40 }
 0x1ca   : > { %v1098_v17 = vmax.f32 %v1082_v46, 0.0 }
 0x1cc   : > { %v1114_v58 = vmul.f32 %v1098_v17, %v898_v56 }
 0x21d   : > { %v1133_v57 = vpop.permute.xlu1 %1132 }
 0x21e   : > { %v1214_v59 = vadd.f32 %v1213_v50, %v1133_v57 }
 0x220   : > { %v1230_v61 = vsub.f32 %v1214_v59, %v1114_v58 }
 0x222   : > { %v1246_v16 = vmul.f32 0.3, %v1230_v61  ;;  %v1340_v1 = vpop.permute.xlu1 %1339 }
 0x223   : > { %v1345_v2 = vrot.slane %v1340_v1, %v2078_v12 }
 0x224   : > { %vm1262_vm9 = vcmp.ge.f32.partialorder %v1114_v58, %v1246_v16  ;;  %v2258_v16 = vsel %vm1487_vm2, 1.0, %v2678_v63 }
 0x225   : > { %v1808_v62 = vsel %vm1262_vm9, 1.0, %v2678_v63  ;;  %v1346_v15 = vmul.f32 %v2193_v10, %v1345_v2  ;;  %vm1607_vm9 = vcmp.eq.s32.totalorder %v2188_v9, 7 }
 0x226   : > { %1310 = vst [vmem:[#allocation2] sm:$0xff] %v1808_v62 }
 0x22d   : > { %v1361_v5 = vld [vmem:[#allocation2] sm:$0x1]  ;;  %v1401_v14 = vld [vmem:[#allocation2 + $0x1] sm:$0x1]  ;;  %v1441_v27 = vld [vmem:[#allocation2 + $0x2] sm:$0x1] }
 0x22e   : > { %v1362_v6 = vmul.f32 %v1361_v5, %v1345_v2  ;;  %v1481_v51 = vld [vmem:[#allocation2 + $0x3] sm:$0x1]  ;;  %v1521_v1 = vld [vmem:[#allocation2 + $0x4] sm:$0x1] }
 0x230   : > { %v1363_v7 = vmax.f32 %v1824_v0, %v1362_v6  ;;  %v2196_v0 = vsel %vm1367_vm12, 1.0, %v2678_v63 }
 0x232   : > { %vm1364_vm10 = vcmp.lt.f32.partialorder %v1363_v7, 0.5 }
 0x233   : > { %v2183_v60 = vsel %vm1364_vm10, 1.0, %v2678_v63 }
 0x234   : > { %1372 = vperm.xlu1 %1965, %v2183_v60  }
 0x238   : > { %1966 = vset.pattern.permute.xlu1 %v2684_v55 }
 0x2b3   : > { %v1373_v11 = vpop.permute.xlu1 %1372 }
 0x2b4   : > { %v1378_v13 = vrot.slane %v1373_v11, %v2078_v12 }
 0x2b6   : > { %v1402_v18 = vmul.f32 %v1401_v14, %v1378_v13  ;;  %v1379_v4 = vmul.f32 %v2196_v0, %v1378_v13 }
 0x2b8   : > { %v1403_v19 = vmax.f32 %v1363_v7, %v1402_v18  ;;  %v1380_v20 = vadd.f32 %v1379_v4, %v1346_v15 }
 0x2ba   : > { %vm1404_vm13 = vcmp.lt.f32.partialorder %v1403_v19, 0.5 }
 0x2bb   : > { %v2202_v21 = vsel %vm1404_vm13, 1.0, %v2678_v63 }
 0x2bc   : > { %1412 = vperm.xlu1 %1966, %v2202_v21  }
 0x2c0   : > { %1967 = vset.pattern.permute.xlu1 %v2686_v52  ;;  %v2694_v52 = vmov 6  }
 0x33b   : > { %v1413_v23 = vpop.permute.xlu1 %1412 }
 0x33c   : > { %v1418_v25 = vrot.slane %v1413_v23, %v2078_v12 }
 0x33e   : > { %v1419_v30 = vmul.f32 %v2208_v22, %v1418_v25  ;;  %v1442_v34 = vmul.f32 %v1441_v27, %v1418_v25 }
 0x340   : > { %v1443_v37 = vmax.f32 %v1403_v19, %v1442_v34  ;;  %v1420_v40 = vadd.f32 %v1419_v30, %v1380_v20 }
 0x342   : > { %vm1444_vm15 = vcmp.lt.f32.partialorder %v1443_v37, 0.5 }
 0x343   : > { %v2213_v43 = vsel %vm1444_vm15, 1.0, %v2678_v63 }
 0x344   : > { %1452 = vperm.xlu1 %1967, %v2213_v43  }
 0x348   : > { %1968 = vset.pattern.permute.xlu1 %v2680_v54 }
 0x3c3   : > { %v1453_v46 = vpop.permute.xlu1 %1452 }
 0x3c4   : > { %v1458_v50 = vrot.slane %v1453_v46, %v2078_v12 }
 0x3c6   : > { %v1482_v17 = vmul.f32 %v1481_v51, %v1458_v50  ;;  %v1459_v56 = vmul.f32 %v2219_v49, %v1458_v50 }
 0x3c8   : > { %v1483_v57 = vmax.f32 %v1443_v37, %v1482_v17  ;;  %v1460_v58 = vadd.f32 %v1459_v56, %v1420_v40 }
 0x3ca   : > { %vm1484_vm1 = vcmp.lt.f32.partialorder %v1483_v57, 0.5 }
 0x3cb   : > { %v2224_v59 = vsel %vm1484_vm1, 1.0, %v2678_v63 }
 0x3cc   : > { %1492 = vperm.xlu1 %1968, %v2224_v59  }
 0x3d0   : > { %292 = vrot.lane.b32.xlu1 %v2095_v26, %s2009_s24 }
 0x3d1   : > { %1971 = vset.pattern.permute.xlu1 %v2688_v24 }
 0x3d4   : > { %294 = vrot.lane.b32.xlu1 %v2099_v28, %s2009_s24 }
 0x3d8   : > { %296 = vrot.lane.b32.xlu1 %v2101_v29, %s2009_s24 }
 0x3dc   : > { %298 = vrot.lane.b32.xlu1 %v2105_v31, %s2009_s24 }
 0x3e0   : > { %300 = vrot.lane.b32.xlu1 %v2108_v33, %s2009_s24 }
 0x3e4   : > { %302 = vrot.lane.b32.xlu1 %v2112_v35, %s2009_s24 }
 0x3e8   : > { %304 = vrot.lane.b32.xlu1 %v2114_v36, %s2009_s24 }
 0x3ec   : > { %306 = vrot.lane.b32.xlu1 %v2118_v38, %s2009_s24 }
 0x3f0   : > { %308 = vrot.lane.b32.xlu1 %v2120_v39, %s2009_s24 }
 0x3f4   : > { %310 = vrot.lane.b32.xlu1 %v2124_v41, %s2009_s24 }
 0x3f8   : > { %312 = vrot.lane.b32.xlu1 %v2126_v42, %s2009_s24 }
 0x3fc   : > { %314 = vrot.lane.b32.xlu1 %v2130_v44, %s2009_s24 }
 0x400   : > { %316 = vrot.lane.b32.xlu1 %v2132_v45, %s2009_s24 }
 0x404   : > { %320 = vrot.lane.b32.xlu1 %v2140_v48, %s2009_s24 }
 0x44b   : > { %v1493_v61 = vpop.permute.xlu1 %1492 }
 0x44c   : > { %v1498_v62 = vrot.slane %v1493_v61, %v2078_v12 }
 0x44e   : > { %v1522_v2 = vmul.f32 %v1521_v1, %v1498_v62  ;;  %v1499_v5 = vmul.f32 %v2258_v16, %v1498_v62 }
 0x44f   : > { %v293_v6 = vpop.permute.xlu1 %292 }
 0x450   : > { %v2263_v7 = vsub.f32 %v2095_v26, %v293_v6  ;;  %v2265_v11 = vmax.f32 %v1483_v57, %v1522_v2  ;;  %v2267_v13 = vadd.f32 %v1499_v5, %v1460_v58  ;;  %v319_v2 = vpop.permute.xlu0 %318 }
 0x451   : > { %v2333_v6 = vsub.f32 %v2136_v47, %v319_v2 }
 0x452   : > { %372 = vrot.lane.b32.xlu0 %v2263_v7, %s2011_s25  ;;  %vm1524_vm3 = vcmp.lt.f32.partialorder %v2265_v11, 0.5 }
 0x453   : > { %v295_v14 = vpop.permute.xlu1 %294  ;;  %v2276_v18 = vsel %vm1524_vm3, 1.0, %v2678_v63  ;;  %2709 = vst [vmem:[#allocation10_spill] sm:$0xff] %v2333_v6 }
 0x454   : > { %v2273_v15 = vsub.f32 %v2099_v28, %v295_v14 }
 0x456   : > { %2702 = vst [vmem:[#allocation3_spill] sm:$0xff] %v2273_v15  ;;  %1532 = vperm.xlu0 %1969, %v2276_v18   ;;  %374 = vrot.lane.b32.xlu1 %v2273_v15, %s2011_s25 }
 0x457   : > { %v297_v4 = vpop.permute.xlu1 %296 }
 0x458   : > { %v2282_v19 = vsub.f32 %v2101_v29, %v297_v4 }
 0x45a   : > { %376 = vrot.lane.b32.xlu1 %v2282_v19, %s2011_s25  ;;  %1970 = vset.pattern.permute.xlu0 %v2688_v24 }
 0x45b   : > { %v299_v20 = vpop.permute.xlu1 %298 }
 0x45c   : > { %v2288_v23 = vsub.f32 %v2105_v31, %v299_v20 }
 0x45e   : > { %378 = vrot.lane.b32.xlu1 %v2288_v23, %s2011_s25 }
 0x45f   : > { %v301_v25 = vpop.permute.xlu1 %300 }
 0x460   : > { %v2293_v27 = vsub.f32 %v2108_v33, %v301_v25 }
 0x462   : > { %2703 = vst [vmem:[#allocation4_spill] sm:$0xff] %v2293_v27  ;;  %380 = vrot.lane.b32.xlu0 %v2293_v27, %s2011_s25 }
 0x463   : > { %v303_v30 = vpop.permute.xlu1 %302 }
 0x464   : > { %v2298_v34 = vsub.f32 %v2112_v35, %v303_v30 }
 0x466   : > { %382 = vrot.lane.b32.xlu1 %v2298_v34, %s2011_s25 }
 0x467   : > { %v305_v37 = vpop.permute.xlu1 %304 }
 0x468   : > { %v2303_v40 = vsub.f32 %v2114_v36, %v305_v37 }
 0x46a   : > { %2704 = vst [vmem:[#allocation5_spill] sm:$0xff] %v2303_v40  ;;  %384 = vrot.lane.b32.xlu0 %v2303_v40, %s2011_s25 }
 0x46b   : > { %v307_v46 = vpop.permute.xlu1 %306 }
 0x46c   : > { %v2308_v50 = vsub.f32 %v2118_v38, %v307_v46  ;;  %v2398_v46 = vsel %vm1527_vm4, 1.0, %v2678_v63 }
 0x46e   : > { %386 = vrot.lane.b32.xlu1 %v2308_v50, %s2011_s25 }
 0x46f   : > { %v309_v51 = vpop.permute.xlu1 %308 }
 0x470   : > { %v2313_v17 = vsub.f32 %v2120_v39, %v309_v51 }
 0x472   : > { %2705 = vst [vmem:[#allocation6_spill] sm:$0xff] %v2313_v17  ;;  %388 = vrot.lane.b32.xlu0 %v2313_v17, %s2011_s25 }
 0x473   : > { %v311_v56 = vpop.permute.xlu1 %310 }
 0x474   : > { %v2318_v57 = vsub.f32 %v2124_v41, %v311_v56  ;;  %v1561_v56 = vld [vmem:[#allocation2 + $0x5] sm:$0x1] }
 0x476   : > { %2706 = vst [vmem:[#allocation7_spill] sm:$0xff] %v2318_v57  ;;  %390 = vrot.lane.b32.xlu1 %v2318_v57, %s2011_s25 }
 0x477   : > { %v313_v58 = vpop.permute.xlu1 %312 }
 0x478   : > { %v2323_v61 = vsub.f32 %v2126_v42, %v313_v58 }
 0x47a   : > { %2707 = vst [vmem:[#allocation8_spill] sm:$0xff] %v2323_v61  ;;  %392 = vrot.lane.b32.xlu0 %v2323_v61, %s2011_s25 }
 0x47b   : > { %v315_v62 = vpop.permute.xlu1 %314 }
 0x47c   : > { %v2328_v1 = vsub.f32 %v2130_v44, %v315_v62 }
 0x47e   : > { %2708 = vst [vmem:[#allocation9_spill] sm:$0xff] %v2328_v1  ;;  %394 = vrot.lane.b32.xlu1 %v2328_v1, %s2011_s25 }
 0x47f   : > { %v317_v5 = vpop.permute.xlu1 %316 }
 0x480   : > { %v2336_v14 = vsub.f32 %v2132_v45, %v317_v5 }
 0x482   : > { %2710 = vst [vmem:[#allocation11_spill] sm:$0xff] %v2336_v14  ;;  %398 = vrot.lane.b32.xlu1 %v2333_v6, %s2011_s25  ;;  %396 = vrot.lane.b32.xlu0 %v2336_v14, %s2011_s25 }
 0x483   : > { %v321_v4 = vpop.permute.xlu1 %320 }
 0x484   : > { %v2343_v20 = vsub.f32 %v2140_v48, %v321_v4 }
 0x486   : > { %2711 = vst [vmem:[#allocation12_spill] sm:$0xff] %v2343_v20  ;;  %436 = vrot.lane.b32.xlu1 %v2263_v7, %s2012_s26  ;;  %400 = vrot.lane.b32.xlu0 %v2343_v20, %s2011_s25 }
 0x48a   : > { %440 = vrot.lane.b32.xlu1 %v2282_v19, %s2012_s26  ;;  %438 = vrot.lane.b32.xlu0 %v2273_v15, %s2012_s26 }
 0x48e   : > { %444 = vrot.lane.b32.xlu1 %v2293_v27, %s2012_s26  ;;  %442 = vrot.lane.b32.xlu0 %v2288_v23, %s2012_s26 }
 0x492   : > { %448 = vrot.lane.b32.xlu1 %v2303_v40, %s2012_s26  ;;  %446 = vrot.lane.b32.xlu0 %v2298_v34, %s2012_s26 }
 0x496   : > { %452 = vrot.lane.b32.xlu1 %v2313_v17, %s2012_s26  ;;  %450 = vrot.lane.b32.xlu0 %v2308_v50, %s2012_s26 }
 0x49a   : > { %456 = vrot.lane.b32.xlu1 %v2323_v61, %s2012_s26  ;;  %454 = vrot.lane.b32.xlu0 %v2318_v57, %s2012_s26 }
 0x49e   : > { %460 = vrot.lane.b32.xlu1 %v2336_v14, %s2012_s26  ;;  %458 = vrot.lane.b32.xlu0 %v2328_v1, %s2012_s26  ;;  %v2722_v14 = vmov 0  }
 0x4a2   : > { %464 = vrot.lane.b32.xlu1 %v2343_v20, %s2012_s26  ;;  %462 = vrot.lane.b32.xlu0 %v2333_v6, %s2012_s26 }
 0x4a6   : > { %1397 = vrot.lane.b32.xlu1 %v2183_v60, %s2011_s25  ;;  %503 = vperm.xlu0 %1970, %v2095_v26  }
 0x4aa   : > { %1437 = vrot.lane.b32.xlu1 %v2202_v21, %s2012_s26  ;;  %1477 = vrot.lane.b32.xlu0 %v2213_v43, %s2019_s27 }
 0x4ae   : > { %1517 = vrot.lane.b32.xlu1 %v2224_v59, %s2020_s28  ;;  %1557 = vrot.lane.b32.xlu0 %v2276_v18, %s2021_s29 }
 0x4b2   : > { %507 = vperm.xlu0 %1970, %v2099_v28  }
 0x4b6   : > { %515 = vperm.xlu0 %1970, %v2105_v31  }
 0x4ba   : > { %523 = vperm.xlu0 %1970, %v2112_v35  }
 0x4be   : > { %531 = vperm.xlu0 %1970, %v2118_v38  }
 0x4c2   : > { %539 = vperm.xlu0 %1970, %v2124_v41  }
 0x4c4   : > { %v2392_v25 = vpop.permute.xlu0 %372 }
 0x4c6   : > { %547 = vperm.xlu0 %1970, %v2130_v44  }
 0x4c8   : > { %v2395_v30 = vpop.permute.xlu1 %374 }
 0x4c9   : > { %2712 = vst [vmem:[#allocation13_spill] sm:$0xff] %v2395_v30 }
 0x4ca   : > { %1382 = vrot.lane.b32.xlu0 %v2164_v3, %s2022_s30 }
 0x4cc   : > { %v2402_v2 = vpop.permute.xlu1 %376 }
 0x4d5   : > { %v1533_v37 = vpop.permute.xlu0 %1532 }
 0x4d6   : > { %v1538_v51 = vrot.slane %v1533_v37, %v2078_v12  ;;  %v2415_v37 = vpop.permute.xlu1 %378 }
 0x4d8   : > { %v1562_v58 = vmul.f32 %v1561_v56, %v1538_v51  ;;  %v1539_v62 = vmul.f32 %v2398_v46, %v1538_v51 }
 0x4d9   : > { %v2417_v56 = vpop.permute.xlu0 %380 }
 0x4da   : > { %v2405_v5 = vmax.f32 %v2265_v11, %v1562_v58  ;;  %v2408_v4 = vadd.f32 %v1539_v62, %v2267_v13  ;;  %2713 = vst [vmem:[#allocation14_spill] sm:$0xff] %v2417_v56  ;;  %v2420_v51 = vpop.permute.xlu1 %382 }
 0x4dc   : > { %vm1564_vm5 = vcmp.lt.f32.partialorder %v2405_v5, 0.5 }
 0x4dd   : > { %v2412_v32 = vsel %vm1564_vm5, 1.0, %v2678_v63  ;;  %v2423_v11 = vpop.permute.xlu0 %384 }
 0x4de   : > { %1597 = vrot.lane.b32.xlu1 %v2412_v32, %s2023_s4  ;;  %2714 = vst [vmem:[#allocation15_spill] sm:$0xff] %v2423_v11 }
 0x4e0   : > { %v2425_v13 = vpop.permute.xlu1 %386 }
 0x4e2   : > { %511 = vperm.xlu1 %1971, %v2101_v29  }
 0x4e4   : > { %v2428_v58 = vpop.permute.xlu0 %388 }
 0x4e5   : > { %2715 = vst [vmem:[#allocation16_spill] sm:$0xff] %v2428_v58 }
 0x4e6   : > { %519 = vperm.xlu1 %1971, %v2108_v33  }
 0x4e8   : > { %v2430_v62 = vpop.permute.xlu1 %390 }
 0x4e9   : > { %2716 = vst [vmem:[#allocation17_spill] sm:$0xff] %v2430_v62  ;;  %v1601_v62 = vld [vmem:[#allocation2 + $0x6] sm:$0x1] }
 0x4ea   : > { %527 = vperm.xlu1 %1971, %v2114_v36  }
 0x4ec   : > { %v2433_v63 = vpop.permute.xlu0 %392 }
 0x4ed   : > { %2717 = vst [vmem:[#allocation18_spill] sm:$0xff] %v2433_v63 }
 0x4ee   : > { %535 = vperm.xlu1 %1971, %v2120_v39  }
 0x4f0   : > { %v2435_v54 = vpop.permute.xlu1 %394 }
 0x4f1   : > { %2718 = vst [vmem:[#allocation19_spill] sm:$0xff] %v2435_v54 }
 0x4f2   : > { %543 = vperm.xlu1 %1971, %v2126_v42  }
 0x4f4   : > { %v2438_v53 = vpop.permute.xlu0 %396  ;;  %v2440_v55 = vpop.permute.xlu1 %398 }
 0x4f5   : > { %2719 = vst [vmem:[#allocation20_spill] sm:$0xff] %v2438_v53  ;;  %2720 = vst [vmem:[#allocation21_spill] sm:$0xff] %v2440_v55 }
 0x4f6   : > { %1972 = vset.pattern.permute.xlu1 %v2694_v52 }
 0x4f7   : > { %1572 = vperm.xlu1 %1972, %v2412_v32  }
 0x4f8   : > { %v2444_v24 = vpop.permute.xlu0 %400  ;;  %v2446_v20 = vpop.permute.xlu1 %436 }
 0x4f9   : > { %2721 = vst [vmem:[#allocation22_spill] sm:$0xff] %v2444_v24 }
 0x4fb   : > { %1973 = vset.pattern.permute.xlu1 %v2722_v14 }
 0x4fc   : > { %v2449_v63 = vpop.permute.xlu1 %440  ;;  %v2451_v61 = vpop.permute.xlu0 %438 }
 0x4fd   : > { %2723 = vst [vmem:[#allocation23_spill] sm:$0xff] %v2451_v61 }
 0x500   : > { %v2453_v58 = vpop.permute.xlu1 %444  ;;  %v2455_v53 = vpop.permute.xlu0 %442 }
 0x501   : > { %2724 = vst [vmem:[#allocation24_spill] sm:$0xff] %v2453_v58 }
 0x504   : > { %v2457_v17 = vpop.permute.xlu1 %448  ;;  %v2461_v52 = vpop.permute.xlu0 %446 }
 0x505   : > { %2725 = vst [vmem:[#allocation25_spill] sm:$0xff] %v2457_v17 }
 0x508   : > { %v2459_v11 = vpop.permute.xlu1 %452  ;;  %v2465_v24 = vpop.permute.xlu0 %450 }
 0x509   : > { %2726 = vst [vmem:[#allocation26_spill] sm:$0xff] %v2459_v11  ;;  %2728 = vst [vmem:[#allocation28_spill] sm:$0xff] %v2465_v24 }
 0x50c   : > { %v2463_v40 = vpop.permute.xlu1 %456  ;;  %v2471_v56 = vpop.permute.xlu0 %454 }
 0x50d   : > { %2727 = vst [vmem:[#allocation27_spill] sm:$0xff] %v2463_v40  ;;  %2731 = vst [vmem:[#allocation31_spill] sm:$0xff] %v2471_v56 }
 0x510   : > { %v2467_v55 = vpop.permute.xlu1 %460  ;;  %v2474_v61 = vpop.permute.xlu0 %458 }
 0x511   : > { %2729 = vst [vmem:[#allocation29_spill] sm:$0xff] %v2467_v55  ;;  %2732 = vst [vmem:[#allocation32_spill] sm:$0xff] %v2474_v61 }
 0x514   : > { %v2469_v6 = vpop.permute.xlu1 %464  ;;  %v2477_v40 = vpop.permute.xlu0 %462 }
 0x515   : > { %2730 = vst [vmem:[#allocation30_spill] sm:$0xff] %v2469_v6  ;;  %2733 = vst [vmem:[#allocation33_spill] sm:$0xff] %v2477_v40 }
 0x518   : > { %v1398_v27 = vpop.permute.xlu1 %1397 }
 0x519   : > { %v1400_v58 = vadd.f32 %v2164_v3, %v1398_v27 }
 0x51b   : > { %1422 = vrot.lane.b32.xlu1 %v1400_v58, %s2025_s5 }
 0x51c   : > { %v1438_v11 = vpop.permute.xlu1 %1437 }
 0x51d   : > { %v1440_v17 = vadd.f32 %v1438_v11, %v1400_v58  ;;  %v2734_v58 = vmov 3  }
 0x51f   : > { %1462 = vrot.lane.b32.xlu0 %v1440_v17, %s2009_s24 }
 0x520   : > { %v1518_v30 = vpop.permute.xlu1 %1517 }
 0x525   : > { %v504_v54 = vpop.permute.xlu0 %503 }
 0x529   : > { %v1478_v1 = vpop.permute.xlu0 %1477 }
 0x52a   : > { %v1480_v55 = vadd.f32 %v1478_v1, %v1440_v17  ;;  %v1348_v17 = vmul.f32 0.0, %v2164_v3  ;;  %v2737_v3 = vmov 4  }
 0x52c   : > { %1502 = vrot.lane.b32.xlu1 %v1480_v55, %s2026_s6  ;;  %v1520_v6 = vadd.f32 %v1518_v30, %v1480_v55 }
 0x52d   : > { %v1558_v56 = vpop.permute.xlu0 %1557 }
 0x52e   : > { %v1560_v15 = vadd.f32 %v1558_v56, %v1520_v6  ;;  %1542 = vrot.lane.b32.xlu0 %v1520_v6, %s2027_s7 }
 0x530   : > { %1582 = vrot.lane.b32.xlu1 %v1560_v15, %s2028_s8 }
 0x531   : > { %v508_v27 = vpop.permute.xlu0 %507 }
 0x532   : > { %v2735_v27 = vmov 2  }
 0x534   : > { %551 = vperm.xlu1 %1973, %v2132_v45  }
 0x535   : > { %v516_v11 = vpop.permute.xlu0 %515 }
 0x538   : > { %559 = vperm.xlu1 %1973, %v2140_v48  }
 0x539   : > { %v524_v54 = vpop.permute.xlu0 %523 }
 0x53c   : > { %1974 = vset.pattern.permute.xlu1 %v2734_v58 }
 0x53d   : > { %591 = vperm.xlu1 %1974, %v2099_v28   ;;  %v532_v55 = vpop.permute.xlu0 %531 }
 0x53e   : > { %v2736_v55 = vmov 1  }
 0x541   : > { %595 = vperm.xlu1 %1974, %v2101_v29   ;;  %v540_v1 = vpop.permute.xlu0 %539 }
 0x545   : > { %603 = vperm.xlu1 %1974, %v2108_v33   ;;  %v548_v30 = vpop.permute.xlu0 %547 }
 0x549   : > { %611 = vperm.xlu1 %1974, %v2114_v36   ;;  %v1383_v11 = vpop.permute.xlu0 %1382 }
 0x54a   : > { %v1385_v54 = vmul.f32 %v2183_v60, %v1383_v11 }
 0x54d   : > { %1975 = vset.pattern.permute.xlu1 %v2722_v14 }
 0x54e   : > { %1351 = vperm.xlu1 %1975, %v1348_v17  }
 0x550   : > { %v1598_v6 = vpop.permute.xlu1 %1597 }
 0x551   : > { %v1600_v56 = vadd.f32 %v1598_v6, %v1560_v15  ;;  %v2738_v6 = vmov 0.0  }
 0x552   : > { %1977 = vset.pattern.permute.xlu1 %v2735_v27  ;;  %1894 = vmatprep.mubr.msk.f32.mxu0 %vm2031_vm8, %v2738_v6 }
 0x553   : > { %1622 = vrot.lane.b32.xlu0 %v1600_v56, %s2029_s9  ;;  %v2495_v56 = vsel %vm1567_vm6, 1.0, %v2738_v6 }
 0x557   : > { %555 = vperm.xlu0 %1970, %v2136_v47  }
 0x55b   : > { %1976 = vset.pattern.permute.xlu0 %v2736_v55 }
 0x55c   : > { %1388 = vperm.xlu0 %1976, %v1385_v54  }
 0x560   : > { %1979 = vset.pattern.permute.xlu0 %v2737_v3 }
 0x561   : > { %v512_v1 = vpop.permute.xlu1 %511 }
 0x565   : > { %v520_v14 = vpop.permute.xlu1 %519 }
 0x569   : > { %v528_v17 = vpop.permute.xlu1 %527 }
 0x56a   : > { %v2739_v17 = vmov 5  }
 0x56d   : > { %v536_v40 = vpop.permute.xlu1 %535 }
 0x571   : > { %v544_v30 = vpop.permute.xlu1 %543 }
 0x576   : > { %v1573_v15 = vpop.permute.xlu1 %1572 }
 0x577   : > { %v1578_v61 = vrot.slane %v1573_v15, %v2078_v12 }
 0x579   : > { %v1579_v60 = vmul.f32 %v2495_v56, %v1578_v61  ;;  %v1602_v24 = vmul.f32 %v1601_v62, %v1578_v61 }
 0x57b   : > { %v2500_v11 = vadd.f32 %v1579_v60, %v2408_v4 }
 0x58d   : > { %v1423_v54 = vpop.permute.xlu1 %1422 }
 0x58e   : > { %v1425_v1 = vmul.f32 %v2202_v21, %v1423_v54  ;;  %v1603_v21 = vmax.f32 %v2405_v5, %v1602_v24  ;;  %v2030_v54 = vmov 7  }
 0x590   : > { %1428 = vperm.xlu1 %1977, %v1425_v1   ;;  %v2740_v1 = vmov 6   ;;  %vm1604_vm7 = vcmp.lt.f32.partialorder %v1603_v21, 0.5 }
 0x591   : > { %v1463_v14 = vpop.permute.xlu0 %1462 }
 0x592   : > { %v1465_v40 = vmul.f32 %v2213_v43, %v1463_v14 }
 0x594   : > { %1978 = vset.pattern.permute.xlu1 %v2734_v58 }
 0x595   : > { %1468 = vperm.xlu1 %1978, %v1465_v40  }
 0x599   : > { %1980 = vset.pattern.permute.xlu1 %v2739_v17 }
 0x59e   : > { %v1503_v30 = vpop.permute.xlu1 %1502 }
 0x59f   : > { %v1505_v15 = vmul.f32 %v2224_v59, %v1503_v30  ;;  %v1839_v59 = vsel %vm1604_vm7, 1.0, %v2738_v6 }
 0x5a0   : > { %v1543_v57 = vpop.permute.xlu0 %1542 }
 0x5a1   : > { %v1545_v4 = vmul.f32 %v2276_v18, %v1543_v57  ;;  %1508 = vperm.xlu0 %1979, %v1505_v15  }
 0x5a2   : > { %v1583_v60 = vpop.permute.xlu1 %1582 }
 0x5a3   : > { %1548 = vperm.xlu1 %1980, %v1545_v4   ;;  %v1585_v43 = vmul.f32 %v2412_v32, %v1583_v60 }
 0x5a5   : > { %1982 = vset.pattern.permute.xlu0 %v2030_v54 }
 0x5a7   : > { %1981 = vset.pattern.permute.xlu1 %v2740_v1 }
 0x5a8   : > { %1588 = vperm.xlu1 %1981, %v1585_v43  }
 0x5ac   : > { %1983 = vset.pattern.permute.xlu1 %v2030_v54 }
 0x5ad   : > { %1612 = vperm.xlu1 %1983, %v1839_v59  }
 0x5b1   : > { %1984 = vset.pattern.permute.xlu1 %v2734_v58 }
 0x5b2   : > { %619 = vperm.xlu1 %1984, %v2120_v39  }
 0x5b3   : > { %v552_v18 = vpop.permute.xlu1 %551 }
 0x5b6   : > { %627 = vperm.xlu1 %1984, %v2126_v42  }
 0x5b7   : > { %v560_v57 = vpop.permute.xlu1 %559 }
 0x5ba   : > { %631 = vperm.xlu1 %1984, %v2130_v44  }
 0x5bc   : > { %v592_v61 = vpop.permute.xlu1 %591 }
 0x5be   : > { %639 = vperm.xlu1 %1984, %v2136_v47  }
 0x5c0   : > { %v596_v5 = vpop.permute.xlu1 %595 }
 0x5c2   : > { %1985 = vset.pattern.permute.xlu1 %v2736_v55 }
 0x5c3   : > { %703 = vperm.xlu1 %1985, %v2095_v26  }
 0x5c4   : > { %v604_v62 = vpop.permute.xlu1 %603 }
 0x5c5   : > { %v1623_v24 = vpop.permute.xlu0 %1622 }
 0x5c6   : > { %v1625_v32 = vmul.f32 %v1839_v59, %v1623_v24 }
 0x5c7   : > { %711 = vperm.xlu1 %1985, %v2101_v29  }
 0x5c8   : > { %1628 = vperm.xlu0 %1982, %v1625_v32  }
 0x5cb   : > { %715 = vperm.xlu1 %1985, %v2105_v31  }
 0x5cc   : > { %1986 = vset.pattern.permute.xlu0 %v2736_v55  ;;  %v612_v55 = vpop.permute.xlu1 %611 }
 0x5cd   : > { %707 = vperm.xlu0 %1986, %v2099_v28  }
 0x5cf   : > { %723 = vperm.xlu1 %1985, %v2112_v35  }
 0x5d1   : > { %719 = vperm.xlu0 %1986, %v2108_v33  }
 0x5d3   : > { %731 = vperm.xlu1 %1985, %v2118_v38  }
 0x5d5   : > { %727 = vperm.xlu0 %1986, %v2114_v36  }
 0x5d6   : > { %v556_v4 = vpop.permute.xlu0 %555 }
 0x5d7   : > { %739 = vperm.xlu1 %1985, %v2124_v41  }
 0x5d9   : > { %735 = vperm.xlu0 %1986, %v2120_v39  }
 0x5db   : > { %747 = vperm.xlu1 %1985, %v2130_v44  }
 0x5dd   : > { %743 = vperm.xlu0 %1986, %v2126_v42  }
 0x5df   : > { %755 = vperm.xlu1 %1985, %v2136_v47  }
 0x5e1   : > { %751 = vperm.xlu0 %1986, %v2132_v45  }
 0x5e3   : > { %1987 = vset.pattern.permute.xlu1 %v2737_v3 }
 0x5e4   : > { %787 = vperm.xlu1 %1987, %v2095_v26  }
 0x5e5   : > { %759 = vperm.xlu0 %1986, %v2140_v48  }
 0x5e8   : > { %795 = vperm.xlu1 %1987, %v2101_v29  }
 0x5e9   : > { %1988 = vset.pattern.permute.xlu0 %v2737_v3  ;;  %v1352_v3 = vpop.permute.xlu1 %1351 }
 0x5ea   : > { %791 = vperm.xlu0 %1988, %v2099_v28  }
 0x5ec   : > { %799 = vperm.xlu1 %1987, %v2105_v31  }
 0x5ee   : > { %803 = vperm.xlu0 %1988, %v2108_v33  }
 0x5f0   : > { %807 = vperm.xlu1 %1987, %v2112_v35  }
 0x5f2   : > { %811 = vperm.xlu0 %1988, %v2114_v36  }
 0x5f4   : > { %815 = vperm.xlu1 %1987, %v2118_v38  }
 0x5f6   : > { %819 = vperm.xlu0 %1988, %v2120_v39  }
 0x5f8   : > { %823 = vperm.xlu1 %1987, %v2124_v41  }
 0x5fa   : > { %827 = vperm.xlu0 %1988, %v2126_v42  }
 0x5fc   : > { %831 = vperm.xlu1 %1987, %v2130_v44  }
 0x5fe   : > { %835 = vperm.xlu0 %1988, %v2132_v45  }
 0x600   : > { %839 = vperm.xlu1 %1987, %v2136_v47  }
 0x602   : > { %843 = vperm.xlu0 %1988, %v2140_v48  }
 0x604   : > { %1989 = vset.pattern.permute.xlu1 %v2735_v27 }
 0x605   : > { %919 = vperm.xlu1 %1989, %v2095_v26  }
 0x606   : > { %1990 = vset.pattern.permute.xlu0 %v2735_v27 }
 0x607   : > { %923 = vperm.xlu0 %1990, %v2099_v28  }
 0x609   : > { %927 = vperm.xlu1 %1989, %v2101_v29  }
 0x60b   : > { %935 = vperm.xlu0 %1990, %v2108_v33  }
 0x60d   : > { %931 = vperm.xlu1 %1989, %v2105_v31  }
 0x60f   : > { %943 = vperm.xlu0 %1990, %v2114_v36   ;;  %v1429_v27 = vpop.permute.xlu1 %1428 }
 0x611   : > { %939 = vperm.xlu1 %1989, %v2112_v35  }
 0x613   : > { %951 = vperm.xlu0 %1990, %v2120_v39  }
 0x614   : > { %v1469_v14 = vpop.permute.xlu1 %1468 }
 0x615   : > { %947 = vperm.xlu1 %1989, %v2118_v38   ;;  %v1474_v59 = vrot.slane %v1469_v14, %v2078_v12 }
 0x617   : > { %959 = vperm.xlu0 %1990, %v2126_v42   ;;  %v1475_v57 = vmul.f32 %v2219_v49, %v1474_v59  ;;  %v419_v49 = vmul.f32 %v2392_v25, %v2263_v7  ;;  %v1840_v7 = vsel %vm1607_vm9, 1.0, %v2738_v6 }
 0x619   : > { %955 = vperm.xlu1 %1989, %v2124_v41  }
 0x61b   : > { %967 = vperm.xlu0 %1990, %v2132_v45  }
 0x61d   : > { %963 = vperm.xlu1 %1989, %v2130_v44  }
 0x61f   : > { %975 = vperm.xlu0 %1990, %v2140_v48  }
 0x621   : > { %971 = vperm.xlu1 %1989, %v2136_v47  }
 0x622   : > { %v1549_v40 = vpop.permute.xlu1 %1548 }
 0x623   : > { %1992 = vset.pattern.permute.xlu0 %v2739_v17 }
 0x624   : > { %1007 = vperm.xlu0 %1992, %v2099_v28   ;;  %v1389_v28 = vpop.permute.xlu0 %1388 }
 0x625   : > { %1991 = vset.pattern.permute.xlu1 %v2739_v17  ;;  %v1394_v21 = vrot.slane %v1389_v28, %v2078_v12  ;;  %v2743_v28 = vld [vmem:[#allocation17_spill] sm:$0xff] }
 0x626   : > { %1003 = vperm.xlu1 %1991, %v2095_v26  }
 0x627   : > { %v1589_v30 = vpop.permute.xlu1 %1588 }
 0x628   : > { %1019 = vperm.xlu0 %1992, %v2108_v33   ;;  %v1357_v33 = vrot.slane %v1352_v3, %v2078_v12  ;;  %v1594_v5 = vrot.slane %v1589_v30, %v2078_v12 }
 0x62a   : > { %1011 = vperm.xlu1 %1991, %v2101_v29   ;;  %v1434_v29 = vrot.slane %v1429_v27, %v2078_v12  ;;  %v1358_v1 = vmul.f32 %v2193_v10, %v1357_v33  ;;  %v1554_v10 = vrot.slane %v1549_v40, %v2078_v12  ;;  %v421_v27 = vmul.f32 %v2402_v2, %v2282_v19 }
 0x62c   : > { %1027 = vperm.xlu0 %1992, %v2114_v36   ;;  %v1613_v15 = vpop.permute.xlu1 %1612  ;;  %v1509_v36 = vpop.permute.xlu0 %1508 }
 0x62d   : > { %v1514_v24 = vrot.slane %v1509_v36, %v2078_v12  ;;  %v1618_v3 = vrot.slane %v1613_v15, %v2078_v12  ;;  %v2747_v36 = vld [vmem:[#allocation9_spill] sm:$0xff] }
 0x62e   : > { %1015 = vperm.xlu1 %1991, %v2105_v31  }
 0x630   : > { %1035 = vperm.xlu0 %1992, %v2120_v39   ;;  %v1395_v39 = vmul.f32 %v2196_v0, %v1394_v21  ;;  %v1515_v0 = vmul.f32 %v2258_v16, %v1514_v24  ;;  %v483_v16 = vmul.f32 %v2446_v20, %v419_v49  ;;  %v485_v20 = vmul.f32 %v2449_v63, %v421_v27  ;;  %v2745_v21 = vld [vmem:[#allocation13_spill] sm:$0xff]  ;;  %v2751_v24 = vld [vmem:[#allocation14_spill] sm:$0xff] }
 0x631   : > { %v620_v60 = vpop.permute.xlu1 %619  ;;  %v2756_v49 = vld [vmem:[#allocation5_spill] sm:$0xff] }
 0x632   : > { %1023 = vperm.xlu1 %1991, %v2112_v35   ;;  %v1396_v18 = vadd.f32 %v1395_v39, %v1358_v1  ;;  %v2749_v1 = vld [vmem:[#allocation23_spill] sm:$0xff] }
 0x634   : > { %1043 = vperm.xlu0 %1992, %v2126_v42   ;;  %v1435_v42 = vmul.f32 %v2208_v22, %v1434_v29  ;;  %v2746_v29 = vld [vmem:[#allocation31_spill] sm:$0xff] }
 0x635   : > { %v628_v17 = vpop.permute.xlu1 %627 }
 0x636   : > { %1031 = vperm.xlu1 %1991, %v2118_v38   ;;  %v1436_v61 = vadd.f32 %v1435_v42, %v1396_v18  ;;  %v2750_v42 = vld [vmem:[#allocation4_spill] sm:$0xff] }
 0x637   : > { %v2752_v18 = vld [vmem:[#allocation32_spill] sm:$0xff] }
 0x638   : > { %1051 = vperm.xlu0 %1992, %v2132_v45   ;;  %v1476_v22 = vadd.f32 %v1475_v57, %v1436_v61 }
 0x639   : > { %v632_v43 = vpop.permute.xlu1 %631 }
 0x63a   : > { %1039 = vperm.xlu1 %1991, %v2124_v41   ;;  %v1516_v55 = vadd.f32 %v1515_v0, %v1476_v22  ;;  %v2748_v43 = vld [vmem:[#allocation19_spill] sm:$0xff]  ;;  %v2753_v0 = vld [vmem:[#allocation10_spill] sm:$0xff] }
 0x63b   : > { %v430_v39 = vmul.f32 %v2748_v43, %v2747_v36 }
 0x63c   : > { %1059 = vperm.xlu0 %1992, %v2140_v48  }
 0x63d   : > { %v640_v32 = vpop.permute.xlu1 %639  ;;  %v494_v57 = vmul.f32 %v2752_v18, %v430_v39 }
 0x63e   : > { %1047 = vperm.xlu1 %1991, %v2130_v44   ;;  %v1555_v44 = vmul.f32 %v2398_v46, %v1554_v10  ;;  %v423_v32 = vmul.f32 %v2751_v24, %v2750_v42  ;;  %v2754_v10 = vld [vmem:[#allocation21_spill] sm:$0xff] }
 0x63f   : > { %v432_v22 = vmul.f32 %v2754_v10, %v2753_v0 }
 0x640   : > { %1993 = vset.pattern.permute.xlu0 %v2734_v58  ;;  %v1556_v46 = vadd.f32 %v1555_v44, %v1516_v55  ;;  %v2757_v55 = vld [vmem:[#allocation15_spill] sm:$0xff] }
 0x641   : > { %587 = vperm.xlu0 %1993, %v2095_v26   ;;  %v1595_v26 = vmul.f32 %v2495_v56, %v1594_v5  ;;  %v1619_v56 = vmul.f32 %v1840_v7, %v1618_v3  ;;  %v2755_v5 = vld [vmem:[#allocation24_spill] sm:$0xff]  ;;  %v425_v44 = vmul.f32 %v2757_v55, %v2756_v49  ;;  %v2759_v3 = vld [vmem:[#allocation25_spill] sm:$0xff] }
 0x642   : > { %1055 = vperm.xlu1 %1991, %v2136_v47   ;;  %v704_v62 = vpop.permute.xlu1 %703 }
 0x645   : > { %599 = vperm.xlu0 %1993, %v2105_v31   ;;  %v1596_v31 = vadd.f32 %v1595_v26, %v1556_v46  ;;  %v2761_v46 = vld [vmem:[#allocation16_spill] sm:$0xff] }
 0x646   : > { %1994 = vset.pattern.permute.xlu1 %v2734_v58  ;;  %v712_v47 = vpop.permute.xlu1 %711  ;;  %v422_v58 = vmul.f32 %v2415_v37, %v2288_v23  ;;  %v2032_v37 = vmov 1.0  }
 0x647   : > { %v1629_v25 = vpop.permute.xlu0 %1628  ;;  %1137 = vperm.xlu1 %1994, %v483_v16   ;;  %v2758_v16 = vld [vmem:[#allocation33_spill] sm:$0xff]  ;;  %v489_v47 = vmul.f32 %v2759_v3, %v425_v44 }
 0x648   : > { %v1634_v9 = vrot.slane %v1629_v25, %v2078_v12  ;;  %v486_v6 = vmul.f32 %v2455_v53, %v422_v58  ;;  %v1620_v12 = vadd.f32 %v1619_v56, %v2500_v11  ;;  %v496_v26 = vmul.f32 %v2758_v16, %v432_v22  ;;  %v2760_v25 = vld [vmem:[#allocation6_spill] sm:$0xff] }
 0x649   : > { %607 = vperm.xlu0 %1993, %v2112_v35   ;;  %v424_v35 = vmul.f32 %v2420_v51, %v2298_v34  ;;  %v2741_v34 = vld [vmem:[#allocation28_spill] sm:$0xff] }
 0x64a   : > { %v1635_v14 = vmul.f32 %v1840_v7, %v1634_v9  ;;  %v716_v40 = vpop.permute.xlu1 %715  ;;  %vm1641_vm11 = vcmp.gt.f32.partialorder %v1620_v12, 0.5  ;;  %v427_v9 = vmul.f32 %v2761_v46, %v2760_v25 }
 0x64b   : > { %1147 = vperm.xlu1 %1994, %v485_v20   ;;  %v488_v60 = vmul.f32 %v2461_v52, %v424_v35  ;;  %v2742_v52 = vld [vmem:[#allocation7_spill] sm:$0xff]  ;;  %v2762_v20 = vld [vmem:[#allocation26_spill] sm:$0xff] }
 0x64c   : > { %v1636_v19 = vadd.f32 %v1635_v14, %v1596_v31  ;;  %v708_v2 = vpop.permute.xlu0 %707  ;;  %v491_v31 = vmul.f32 %v2762_v20, %v427_v9  ;;  %v2763_v14 = vld [vmem:[#allocation8_spill] sm:$0xff]  ;;  %v2764_v40 = vld [vmem:[#allocation18_spill] sm:$0xff] }
 0x64d   : > { %615 = vperm.xlu0 %1993, %v2118_v38   ;;  %v426_v38 = vmul.f32 %v2425_v13, %v2308_v50  ;;  %v429_v58 = vmul.f32 %v2764_v40, %v2763_v14  ;;  %v2765_v2 = vld [vmem:[#allocation27_spill] sm:$0xff] }
 0x64e   : > { %v1921_v30 = vtrunc.f32 %v1636_v19  ;;  %v724_v63 = vpop.permute.xlu1 %723 }
 0x64f   : > { %1152 = vperm.xlu1 %1994, %v486_v6   ;;  %v490_v51 = vmul.f32 %v2741_v34, %v426_v38  ;;  %v493_v6 = vmul.f32 %v2765_v2, %v429_v58  ;;  %v2767_v63 = vld [vmem:[#allocation20_spill] sm:$0xff] }
 0x650   : > { %v1922_v15 = vcvt.f32.s32 %v1921_v30  ;;  %v720_v4 = vpop.permute.xlu0 %719  ;;  %v2766_v30 = vld [vmem:[#allocation11_spill] sm:$0xff]  ;;  %v2769_v38 = vld [vmem:[#allocation12_spill] sm:$0xff] }
 0x651   : > { %623 = vperm.xlu0 %1993, %v2124_v41   ;;  %v428_v41 = vmul.f32 %v2743_v28, %v2742_v52  ;;  %v431_v35 = vmul.f32 %v2767_v63, %v2766_v30  ;;  %v2768_v4 = vld [vmem:[#allocation29_spill] sm:$0xff] }
 0x652   : > { %v732_v23 = vpop.permute.xlu1 %731  ;;  %vm1640_vm10 = vcmp.eq.s32.totalorder %v2071_v8, %v1922_v15  ;;  %v2744_v8 = vld [vmem:[#allocation3_spill] sm:$0xff] }
 0x653   : > { %1162 = vperm.xlu1 %1994, %v488_v60   ;;  %vm1644_vm12 = vmand %vm1640_vm10, %vm1641_vm11  ;;  %v420_v33 = vmul.f32 %v2745_v21, %v2744_v8  ;;  %v492_v50 = vmul.f32 %v2746_v29, %v428_v41  ;;  %v495_v60 = vmul.f32 %v2768_v4, %v431_v35 }
 0x654   : > { %v728_v53 = vpop.permute.xlu0 %727  ;;  %1895 = vmatmul.mubr.msk.f32.vlgmr.msra.gmra.mrb[0].mxu0 %vm1644_vm12, %v2032_v37 }
 0x655   : > { %635 = vperm.xlu0 %1993, %v2132_v45   ;;  %v484_v59 = vmul.f32 %v2749_v1, %v420_v33  ;;  %v2770_v53 = vld [vmem:[#allocation22_spill] sm:$0xff] }
 0x656   : > { %v740_v11 = vpop.permute.xlu1 %739  ;;  %v433_v37 = vmul.f32 %v2770_v53, %v2769_v38 }
 0x657   : > { %1172 = vperm.xlu1 %1994, %v490_v51   ;;  %v2771_v51 = vld [vmem:[#allocation30_spill] sm:$0xff] }
 0x658   : > { %v736_v17 = vpop.permute.xlu0 %735  ;;  %v497_v11 = vmul.f32 %v2771_v51, %v433_v37  ;;  %v2772_v51 = vmov 0  }
 0x659   : > { %643 = vperm.xlu0 %1993, %v2140_v48   ;;  %v487_v48 = vmul.f32 %v2755_v5, %v423_v32 }
 0x65a   : > { %v748_v13 = vpop.permute.xlu1 %747 }
 0x65b   : > { %1182 = vperm.xlu1 %1994, %v492_v50  }
 0x65c   : > { %v744_v45 = vpop.permute.xlu0 %743 }
 0x65d   : > { %1142 = vperm.xlu0 %1993, %v484_v59  }
 0x65e   : > { %v756_v61 = vpop.permute.xlu1 %755 }
 0x65f   : > { %1192 = vperm.xlu1 %1994, %v494_v57  }
 0x660   : > { %v752_v62 = vpop.permute.xlu0 %751 }
 0x661   : > { %1157 = vperm.xlu0 %1993, %v487_v48  }
 0x663   : > { %1202 = vperm.xlu1 %1994, %v496_v26   ;;  %v788_v27 = vpop.permute.xlu1 %787 }
 0x664   : > { %v760_v7 = vpop.permute.xlu0 %759 }
 0x665   : > { %1167 = vperm.xlu0 %1993, %v489_v47  }
 0x667   : > { %v796_v56 = vpop.permute.xlu1 %795  ;;  %1995 = vset.pattern.permute.xlu1 %v2030_v54 }
 0x669   : > { %1177 = vperm.xlu0 %1993, %v491_v31   ;;  %v792_v19 = vpop.permute.xlu0 %791 }
 0x66b   : > { %v800_v12 = vpop.permute.xlu1 %799 }
 0x66d   : > { %1187 = vperm.xlu0 %1993, %v493_v6   ;;  %v804_v15 = vpop.permute.xlu0 %803 }
 0x66f   : > { %v808_v23 = vpop.permute.xlu1 %807 }
 0x671   : > { %1197 = vperm.xlu0 %1993, %v495_v60   ;;  %v812_v34 = vpop.permute.xlu0 %811 }
 0x673   : > { %v816_v52 = vpop.permute.xlu1 %815 }
 0x675   : > { %1207 = vperm.xlu0 %1993, %v497_v11   ;;  %v820_v28 = vpop.permute.xlu0 %819 }
 0x677   : > { %v824_v41 = vpop.permute.xlu1 %823 }
 0x679   : > { %v828_v17 = vpop.permute.xlu0 %827  ;;  %1996 = vset.pattern.permute.xlu0 %v2030_v54 }
 0x67b   : > { %v832_v8 = vpop.permute.xlu1 %831 }
 0x67d   : > { %v836_v21 = vpop.permute.xlu0 %835 }
 0x67f   : > { %v840_v33 = vpop.permute.xlu1 %839 }
 0x681   : > { %v844_v29 = vpop.permute.xlu0 %843 }
 0x684   : > { %v920_v50 = vpop.permute.xlu1 %919 }
 0x686   : > { %v924_v13 = vpop.permute.xlu0 %923 }
 0x688   : > { %v928_v36 = vpop.permute.xlu1 %927 }
 0x68a   : > { %v936_v43 = vpop.permute.xlu0 %935 }
 0x68c   : > { %v932_v39 = vpop.permute.xlu1 %931 }
 0x68e   : > { %v944_v1 = vpop.permute.xlu0 %943 }
 0x690   : > { %v940_v59 = vpop.permute.xlu1 %939 }
 0x692   : > { %v952_v45 = vpop.permute.xlu0 %951 }
 0x694   : > { %v948_v42 = vpop.permute.xlu1 %947 }
 0x696   : > { %v960_v24 = vpop.permute.xlu0 %959 }
 0x698   : > { %v956_v32 = vpop.permute.xlu1 %955 }
 0x69a   : > { %v968_v18 = vpop.permute.xlu0 %967 }
 0x69c   : > { %v964_v57 = vpop.permute.xlu1 %963 }
 0x69e   : > { %v976_v61 = vpop.permute.xlu0 %975 }
 0x6a0   : > { %v972_v0 = vpop.permute.xlu1 %971 }
 0x6a3   : > { %v1008_v54 = vpop.permute.xlu0 %1007 }
 0x6a5   : > { %v1004_v10 = vpop.permute.xlu1 %1003 }
 0x6a7   : > { %v1020_v22 = vpop.permute.xlu0 %1019 }
 0x6a9   : > { %v1012_v5 = vpop.permute.xlu1 %1011 }
 0x6ab   : > { %v1028_v48 = vpop.permute.xlu0 %1027 }
 0x6ad   : > { %v1016_v62 = vpop.permute.xlu1 %1015 }
 0x6af   : > { %v1036_v49 = vpop.permute.xlu0 %1035 }
 0x6b1   : > { %v1024_v55 = vpop.permute.xlu1 %1023 }
 0x6b3   : > { %v1044_v44 = vpop.permute.xlu0 %1043 }
 0x6b5   : > { %v1032_v16 = vpop.permute.xlu1 %1031 }
 0x6b7   : > { %v1052_v26 = vpop.permute.xlu0 %1051 }
 0x6b9   : > { %v1040_v3 = vpop.permute.xlu1 %1039 }
 0x6bb   : > { %v1060_v47 = vpop.permute.xlu0 %1059 }
 0x6bd   : > { %v1048_v27 = vpop.permute.xlu1 %1047 }
 0x6c0   : > { %v588_v7 = vpop.permute.xlu0 %587 }
 0x6c1   : > { %v1056_v25 = vpop.permute.xlu1 %1055 }
 0x6c4   : > { %v600_v46 = vpop.permute.xlu0 %599 }
 0x6c6   : > { %v1138_v9 = vpop.permute.xlu1 %1137 }
 0x6c8   : > { %v608_v20 = vpop.permute.xlu0 %607 }
 0x6ca   : > { %v1148_v31 = vpop.permute.xlu1 %1147 }
 0x6cc   : > { %v616_v56 = vpop.permute.xlu0 %615 }
 0x6ce   : > { %v1153_v14 = vpop.permute.xlu1 %1152 }
 0x6d0   : > { %v624_v40 = vpop.permute.xlu0 %623 }
 0x6d2   : > { %v1163_v58 = vpop.permute.xlu1 %1162 }
 0x6d4   : > { %v636_v19 = vpop.permute.xlu0 %635 }
 0x6d6   : > { %v1173_v2 = vpop.permute.xlu1 %1172 }
 0x6d8   : > { %v644_v6 = vpop.permute.xlu0 %643 }
 0x6da   : > { %v1183_v12 = vpop.permute.xlu1 %1182 }
 0x6dc   : > { %v1143_v30 = vpop.permute.xlu0 %1142 }
 0x6de   : > { %v1193_v63 = vpop.permute.xlu1 %1192 }
 0x6e0   : > { %v1158_v35 = vpop.permute.xlu0 %1157 }
 0x6e2   : > { %v1203_v15 = vpop.permute.xlu1 %1202 }
 0x6e4   : > { %v1168_v4 = vpop.permute.xlu0 %1167 }
 0x6e8   : > { %v1178_v60 = vpop.permute.xlu0 %1177 }
 0x6ec   : > { %v1188_v23 = vpop.permute.xlu0 %1187 }
 0x6f0   : > { %v1198_v38 = vpop.permute.xlu0 %1197 }
 0x6f4   : > { %v1208_v53 = vpop.permute.xlu0 %1207 }
 0x727   : > { %v1713_v37 = vpop.f32.mrb[0].mxu0 }
 0x728   : > { %vm1717_vm13 = vcmp.gt.f32.partialorder %v1713_v37, 0.5  ;;  %v1896_v34 = vpop.f32.mrb[1].mxu0 }
 0x729   : > { %v1718_v11 = vsel %vm1717_vm13, 1, %v2772_v51 }
 0x72a   : > { %1720 = vperm.xlu1 %1995, %v1718_v11  }
 0x7a9   : > { %v1721_v52 = vpop.permute.xlu1 %1720 }
 0x7aa   : > { %vm1722_vm15 = vcmp.eq.s32.totalorder %v1721_v52, 1 }
 0x7ab   : > { %v1723_v28 = vsel %vm1722_vm15, %v1713_v37, -1.0 }
 0x7ac   : > { %1725 = vst.msk [vmem:[%s196_s15] sm:$0xf] %vm1724_vm14, %v1723_v28 }
 0x7ad PF: > { %s13_s12 = sadd.s32 1, %s2005_s12  }
 0x7ae   : > { %p10_p4 = scmp.ge.s32.totalorder %s13_s12, 4  }
 0x7b0   :  { %12 = sbr.rel (!%p10_p4) target bundleno = 1 (0x1), region = 68 }

</bundles_post_ra>
